<compile_context>
chip_gen: v5e
topology: v5e:2x2
jax: 0.10.0
libtpu: 0.0.40
codegen_flags: <defaults>
</compile_context>

<pallas_src>
import math
import jax
import jax.numpy as jnp
from jax.experimental import pallas as pl
from jax.experimental.pallas import tpu as pltpu

EPS = 1e-5                      # PyTorch InstanceNorm2d default eps
_SQRT_2_OVER_PI = 0.7978845608028654
_GELU_C = 0.044715


def _gelu_tanh(x):
    # tanh-approx GELU; the tanh goes to the EUP slot, the rest is ~6 VALU ops.
    return 0.5 * x * (1.0 + jnp.tanh(_SQRT_2_OVER_PI * (x + _GELU_C * x * x * x)))


def _block_diag2(a, b):
    """Block-diagonal stack of two 2-D matrices."""
    o1, i1 = a.shape
    o2, i2 = b.shape
    out = jnp.zeros((o1 + o2, i1 + i2), a.dtype)
    out = out.at[:o1, :i1].set(a)
    out = out.at[o1:, i1:].set(b)
    return out


# ---------------------------------------------------------------------------
# Fused FLU core: both ffconv chains (3 x [1x1 conv -> InstanceNorm -> GELU])
# plus the mag*cos(pha) / mag*sin(pha) recomposition, one pallas_call.
# Layout: channels (mag stacked over pha) on sublanes, padded spectral axis on
# lanes.
# ---------------------------------------------------------------------------
def flu_core(xs, params, n_true):
    """xs: (B, 2C, Np) f32 (mag rows 0..C-1, pha rows C..2C-1, Np % 128 == 0,
    lanes >= n_true zero-padded).  Returns (real, imag), each (B, C, Np)."""
    B, C2, Np = xs.shape
    C = C2 // 2
    Cg = C // 2
    assert Np % 128 == 0

    # Block-diagonal weights / stacked affine params so both branches run fused.
    w0 = _block_diag2(params["w0"][0], params["w0"][1])     # (2Cg, 2C)
    w1x = _block_diag2(params["w1x"][0], params["w1x"][1])  # (2C,  2C)
    w1h = _block_diag2(params["w1h"][0], params["w1h"][1])  # (2C,  2Cg)
    w2x = _block_diag2(params["w2x"][0], params["w2x"][1])  # (2C,  2C)
    w2h = _block_diag2(params["w2h"][0], params["w2h"][1])  # (2C,  2C)
    g0 = params["g0"].reshape(2 * Cg, 1)
    b0 = params["b0"].reshape(2 * Cg, 1)
    g1 = params["g1"].reshape(2 * C, 1)
    b1 = params["b1"].reshape(2 * C, 1)
    g2 = params["g2"].reshape(2 * C, 1)
    b2 = params["b2"].reshape(2 * C, 1)

    inv_n = 1.0 / float(n_true)

    def kernel(x_ref, w0_ref, w1x_ref, w1h_ref, w2x_ref, w2h_ref,
               g0_ref, b0_ref, g1_ref, b1_ref, g2_ref, b2_ref,
               real_ref, imag_ref):
        x = x_ref[0]                                             # (2C, Np)
        lane = jax.lax.broadcasted_iota(jnp.int32, (1, Np), 1)
        valid = lane < n_true                                    # (1, Np) mask

        def in_gelu(y, g, b, zero_pad):
            # InstanceNorm over the true N only (padded lanes of y are zero by
            # construction).  Two-pass centered variance for stability against
            # the large FFT DC bin; affine folded into one FMA over the slab.
            mean = jnp.sum(y, axis=-1, keepdims=True) * inv_n
            yc = jnp.where(valid, y - mean, 0.0)
            var = jnp.sum(yc * yc, axis=-1, keepdims=True) * inv_n
            scale = jax.lax.rsqrt(var + EPS) * g                 # (rows, 1)
            shift = b - mean * scale
            h = _gelu_tanh(y * scale + shift)
            if zero_pad:
                # keep padded lanes exactly zero so later-stage stats stay clean
                h = jnp.where(valid, h, 0.0)
            return h

        dot = lambda w, a: jnp.dot(w, a, preferred_element_type=jnp.float32)

        # stage 0: conv(2C -> 2Cg) -> IN -> GELU   (conv bias cancelled by IN)
        h0 = in_gelu(dot(w0_ref[...], x), g0_ref[...], b0_ref[...], True)
        # stage 1: conv(cat(x, h0) -> 2C): cat handled via weight split
        h1 = in_gelu(dot(w1x_ref[...], x) + dot(w1h_ref[...], h0),
                     g1_ref[...], b1_ref[...], True)
        # stage 2 (fusion): conv(cat(x, h1) -> 2C)
        h2 = in_gelu(dot(w2x_ref[...], x) + dot(w2h_ref[...], h1),
                     g2_ref[...], b2_ref[...], False)

        mag_f = h2[:C]                                           # rows 0..C-1
        pha_f = h2[C:]                                           # rows C..2C-1
        real_ref[0] = mag_f * jnp.cos(pha_f)                     # cos/sin on EUP
        imag_ref[0] = mag_f * jnp.sin(pha_f)

    # VMEM budget from the actual live set: stacked input slab x2 (double
    # buffered) + both output half-slabs x2 + ~8 live intermediate slabs,
    # plus small weight/affine blocks.  Cap at 56 MiB (v7x physical VMEM is
    # 64 MiB), floor at 32 MiB (v5e scoped default is only 16 MiB).
    slab = 4 * C2 * Np
    vlim = int(min(max(16 * slab + (4 << 20), 32 << 20), 56 << 20))

    xspec = pl.BlockSpec((1, C2, Np), lambda i: (i, 0, 0))
    ospec = pl.BlockSpec((1, C, Np), lambda i: (i, 0, 0))
    wspec = lambda shape: pl.BlockSpec(shape, lambda i: (0, 0))

    real, imag = pl.pallas_call(
        kernel,
        out_shape=(jax.ShapeDtypeStruct((B, C, Np), jnp.float32),
                   jax.ShapeDtypeStruct((B, C, Np), jnp.float32)),
        grid=(B,),
        in_specs=[
            xspec,
            wspec((2 * Cg, 2 * C)),     # w0 (block-diag)
            wspec((2 * C, 2 * C)),      # w1x
            wspec((2 * C, 2 * Cg)),     # w1h
            wspec((2 * C, 2 * C)),      # w2x
            wspec((2 * C, 2 * C)),      # w2h
            wspec((2 * Cg, 1)), wspec((2 * Cg, 1)),   # g0, b0
            wspec((2 * C, 1)), wspec((2 * C, 1)),     # g1, b1
            wspec((2 * C, 1)), wspec((2 * C, 1)),     # g2, b2
        ],
        out_specs=(ospec, ospec),
        compiler_params=pltpu.CompilerParams(
            dimension_semantics=("parallel",),
            vmem_limit_bytes=vlim,
        ),
    )(xs, w0, w1x, w1h, w2x, w2h, g0, b0, g1, b1, g2, b2)
    return real, imag


# ---------------------------------------------------------------------------
# FLU forward (matches the PyTorch module; NCHW in / NCHW out)
# ---------------------------------------------------------------------------
def flu_forward(x, params):
    """FLU.forward.  x: (B, C, H, W) f32."""
    x = x.astype(jnp.float32)
    B, C, H, W = x.shape
    # TODO(synk): rfft2 / irfft2 have no Pallas TPU equivalent; they run in XLA.
    fft = jnp.fft.rfft2(x, axes=(-2, -1))                 # norm='backward'
    mag = jnp.abs(fft)
    pha = jnp.angle(fft)
    Wf = mag.shape[-1]
    N = H * Wf
    Np = ((N + 127) // 128) * 128                         # lane-dense spectral axis

    xs = jnp.concatenate([mag.reshape(B, C, N), pha.reshape(B, C, N)], axis=1)
    xs = jnp.pad(xs, ((0, 0), (0, 0), (0, Np - N)))       # zero-pad -> (B, 2C, Np)

    real, imag = flu_core(xs, params, N)
    real = real[:, :, :N].reshape(B, C, H, Wf)
    imag = imag[:, :, :N].reshape(B, C, H, Wf)
    xc = jax.lax.complex(real, imag)
    out = jnp.fft.irfft2(xc, s=(H, W), axes=(-2, -1)).astype(jnp.float32)
    return out + x     # residual left to XLA; fuses with the irfft epilogue


# ---------------------------------------------------------------------------
# Deterministic parameter construction (shapes as implied by ffconv.__init__).
# Branch axis of size 2: 0 -> ffconv1 (mag), 1 -> ffconv2 (pha).
# Conv weights pre-split for the torch.cat inputs:
#   stage-1 weight (C, C+Cg) -> w1x (C, C) + w1h (C, Cg)
#   stage-2 weight (C, 2C)   -> w2x (C, C) + w2h (C, C)
# Conv biases omitted (cancelled exactly by InstanceNorm mean subtraction).
# InstanceNorm affine uses the PyTorch init (gamma=1, beta=0).
# ---------------------------------------------------------------------------
def init_params(key, C):
    Cg = C // 2
    ks = jax.random.split(key, 5)
    s = 0.1
    rnd = lambda k, shape: jax.random.normal(k, shape, jnp.float32) * s
    return {
        "w0": rnd(ks[0], (2, Cg, C)),
        "w1x": rnd(ks[1], (2, C, C)),
        "w1h": rnd(ks[2], (2, C, Cg)),
        "w2x": rnd(ks[3], (2, C, C)),
        "w2h": rnd(ks[4], (2, C, C)),
        "g0": jnp.ones((2, Cg), jnp.float32), "b0": jnp.zeros((2, Cg), jnp.float32),
        "g1": jnp.ones((2, C), jnp.float32), "b1": jnp.zeros((2, C), jnp.float32),
        "g2": jnp.ones((2, C), jnp.float32), "b2": jnp.zeros((2, C), jnp.float32),
    }


# ---------------------------------------------------------------------------
# Pure-JAX reference (exact-erf GELU, same math as the PyTorch module)
# ---------------------------------------------------------------------------
def _ffconv_ref(x, w0, w1x, w1h, w2x, w2h, g0, b0, g1, b1, g2, b2):
    def in_gelu(y, g, bt):
        mean = jnp.mean(y, axis=-1, keepdims=True)
        var = jnp.mean(jnp.square(y - mean), axis=-1, keepdims=True)
        yn = (y - mean) / jnp.sqrt(var + EPS) * g[:, None] + bt[:, None]
        return 0.5 * yn * (1.0 + jax.lax.erf(yn * (1.0 / math.sqrt(2.0))))
    mm = lambda w, a: jnp.einsum("oc,bcn->bon", w, a)
    h0 = in_gelu(mm(w0, x), g0, b0)
    h1 = in_gelu(mm(w1x, x) + mm(w1h, h0), g1, b1)
    return in_gelu(mm(w2x, x) + mm(w2h, h1), g2, b2)


def flu_reference(x, p):
    B, C, H, W = x.shape
    fft = jnp.fft.rfft2(x, axes=(-2, -1))
    mag, pha = jnp.abs(fft), jnp.angle(fft)
    Wf = mag.shape[-1]
    N = H * Wf

    def branch(f, t):
        return _ffconv_ref(t.reshape(B, C, N),
                           p["w0"][f], p["w1x"][f], p["w1h"][f], p["w2x"][f], p["w2h"][f],
                           p["g0"][f], p["b0"][f], p["g1"][f], p["b1"][f],
                           p["g2"][f], p["b2"][f]).reshape(B, C, H, Wf)

    mag_f = branch(0, mag)
    pha_f = branch(1, pha)
    xc = jax.lax.complex(mag_f * jnp.cos(pha_f), mag_f * jnp.sin(pha_f))
    return jnp.fft.irfft2(xc, s=(H, W), axes=(-2, -1)) + x


if __name__ == "__main__":
    key = jax.random.PRNGKey(0)
    kx, kp = jax.random.split(key)

    B, C, H, W = 2, 4, 16, 16
    x = jax.random.normal(kx, (B, C, H, W), jnp.float32)
    params = init_params(kp, C)

    out = jax.jit(flu_forward)(x, params)
    out = jax.block_until_ready(out)

    assert out.shape == (B, C, H, W), out.shape
    assert bool(jnp.all(jnp.isfinite(out)))

    # sanity check against a pure-JAX/XLA reference of the same module
    ref = jax.block_until_ready(jax.jit(flu_reference)(x, params))
    err = float(jnp.max(jnp.abs(out - ref)))
    assert err < 5e-2, f"mismatch vs reference: max|diff|={err}"

    print("KERNEL_OK")
</pallas_src>

<mosaic_0001>
module attributes {stable_mosaic.version = 11 : i64} {
  func.func @kernel(%arg0: i32, %arg1: memref<1x8x256xf32, #tpu.memory_space<vmem>>, %arg2: memref<4x8xf32, #tpu.memory_space<vmem>>, %arg3: memref<8x8xf32, #tpu.memory_space<vmem>>, %arg4: memref<8x4xf32, #tpu.memory_space<vmem>>, %arg5: memref<8x8xf32, #tpu.memory_space<vmem>>, %arg6: memref<8x8xf32, #tpu.memory_space<vmem>>, %arg7: memref<4x1xf32, #tpu.memory_space<vmem>>, %arg8: memref<4x1xf32, #tpu.memory_space<vmem>>, %arg9: memref<8x1xf32, #tpu.memory_space<vmem>>, %arg10: memref<8x1xf32, #tpu.memory_space<vmem>>, %arg11: memref<8x1xf32, #tpu.memory_space<vmem>>, %arg12: memref<8x1xf32, #tpu.memory_space<vmem>>, %arg13: memref<1x4x256xf32, #tpu.memory_space<vmem>>, %arg14: memref<1x4x256xf32, #tpu.memory_space<vmem>>) attributes {dimension_semantics = [#tpu.dimension_semantics<parallel>], iteration_bounds = array<i64: 2>, scalar_prefetch = 0 : i64, scratch_operands = 0 : i64, tpu.core_type = #tpu.core_type<tc>, window_params = [{transform_indices = @transform_0, window_bounds = array<i64: 1, 8, 256>}, {pipeline_mode = #tpu.pipeline_mode<synchronous>, transform_indices = @transform_1, window_bounds = array<i64: 4, 8>}, {pipeline_mode = #tpu.pipeline_mode<synchronous>, transform_indices = @transform_2, window_bounds = array<i64: 8, 8>}, {pipeline_mode = #tpu.pipeline_mode<synchronous>, transform_indices = @transform_3, window_bounds = array<i64: 8, 4>}, {pipeline_mode = #tpu.pipeline_mode<synchronous>, transform_indices = @transform_4, window_bounds = array<i64: 8, 8>}, {pipeline_mode = #tpu.pipeline_mode<synchronous>, transform_indices = @transform_5, window_bounds = array<i64: 8, 8>}, {pipeline_mode = #tpu.pipeline_mode<synchronous>, transform_indices = @transform_6, window_bounds = array<i64: 4, 1>}, {pipeline_mode = #tpu.pipeline_mode<synchronous>, transform_indices = @transform_7, window_bounds = array<i64: 4, 1>}, {pipeline_mode = #tpu.pipeline_mode<synchronous>, transform_indices = @transform_8, window_bounds = array<i64: 8, 1>}, {pipeline_mode = #tpu.pipeline_mode<synchronous>, transform_indices = @transform_9, window_bounds = array<i64: 8, 1>}, {pipeline_mode = #tpu.pipeline_mode<synchronous>, transform_indices = @transform_10, window_bounds = array<i64: 8, 1>}, {pipeline_mode = #tpu.pipeline_mode<synchronous>, transform_indices = @transform_11, window_bounds = array<i64: 8, 1>}, {transform_indices = @transform_12, window_bounds = array<i64: 1, 4, 256>}, {transform_indices = @transform_13, window_bounds = array<i64: 1, 4, 256>}]} {
    %c0 = arith.constant 0 : index
    %c0_0 = arith.constant 0 : index
    %c0_1 = arith.constant 0 : index
    %0 = vector.load %arg1[%c0, %c0_0, %c0_1] : memref<1x8x256xf32, #tpu.memory_space<vmem>>, vector<1x8x256xf32>
    %1 = vector.shape_cast %0 : vector<1x8x256xf32> to vector<8x256xf32>
    %2 = tpu.iota {dimensions = array<i32: 1>} : vector<1x256xi32>
    %c144_i32 = arith.constant 144 : i32
    %3 = vector.broadcast %c144_i32 : i32 to vector<1x256xi32>
    %4 = arith.cmpi slt, %2, %3 : vector<1x256xi32>
    %c0_2 = arith.constant 0 : index
    %c0_3 = arith.constant 0 : index
    %5 = vector.load %arg2[%c0_2, %c0_3] : memref<4x8xf32, #tpu.memory_space<vmem>>, vector<4x8xf32>
    %cst = arith.constant dense<0.000000e+00> : vector<4x256xf32>
    %6 = tpu.matmul %5, %1, %cst {dimension_numbers = #tpu.dot_dimension_numbers<[1], [0], [0], [1], [0, 0, 1, 1], [], []>} : vector<4x8xf32>, vector<8x256xf32>, vector<4x256xf32> -> vector<4x256xf32>
    %c0_4 = arith.constant 0 : index
    %c0_5 = arith.constant 0 : index
    %7 = vector.load %arg7[%c0_4, %c0_5] : memref<4x1xf32, #tpu.memory_space<vmem>>, vector<4x1xf32>
    %c0_6 = arith.constant 0 : index
    %c0_7 = arith.constant 0 : index
    %8 = vector.load %arg8[%c0_6, %c0_7] : memref<4x1xf32, #tpu.memory_space<vmem>>, vector<4x1xf32>
    %cst_8 = arith.constant dense<0.000000e+00> : vector<4xf32>
    %9 = vector.multi_reduction <add>, %6, %cst_8 [1] : vector<4x256xf32> to vector<4xf32>
    %10 = vector.shape_cast %9 : vector<4xf32> to vector<4x1xf32>
    %cst_9 = arith.constant 0.0069444445 : f32
    %11 = vector.broadcast %cst_9 : f32 to vector<4x1xf32>
    %12 = arith.mulf %10, %11 : vector<4x1xf32>
    %13 = vector.broadcast %12 : vector<4x1xf32> to vector<4x256xf32>
    %14 = arith.subf %6, %13 : vector<4x256xf32>
    %cst_10 = arith.constant 0.000000e+00 : f32
    %15 = vector.shape_cast %4 : vector<1x256xi1> to vector<1x256xi1>
    %16 = vector.broadcast %15 : vector<1x256xi1> to vector<4x256xi1>
    %17 = vector.broadcast %cst_10 : f32 to vector<4x256xf32>
    %18 = arith.select %16, %14, %17 : vector<4x256xi1>, vector<4x256xf32>
    %19 = arith.mulf %18, %18 : vector<4x256xf32>
    %cst_11 = arith.constant dense<0.000000e+00> : vector<4xf32>
    %20 = vector.multi_reduction <add>, %19, %cst_11 [1] : vector<4x256xf32> to vector<4xf32>
    %21 = vector.shape_cast %20 : vector<4xf32> to vector<4x1xf32>
    %cst_12 = arith.constant 0.0069444445 : f32
    %22 = vector.broadcast %cst_12 : f32 to vector<4x1xf32>
    %23 = arith.mulf %21, %22 : vector<4x1xf32>
    %cst_13 = arith.constant 9.99999974E-6 : f32
    %24 = vector.broadcast %cst_13 : f32 to vector<4x1xf32>
    %25 = arith.addf %23, %24 : vector<4x1xf32>
    %26 = math.rsqrt %25 : vector<4x1xf32>
    %27 = arith.mulf %26, %7 : vector<4x1xf32>
    %28 = arith.mulf %12, %27 : vector<4x1xf32>
    %29 = arith.subf %8, %28 : vector<4x1xf32>
    %30 = vector.broadcast %27 : vector<4x1xf32> to vector<4x256xf32>
    %31 = arith.mulf %6, %30 : vector<4x256xf32>
    %32 = vector.broadcast %29 : vector<4x1xf32> to vector<4x256xf32>
    %33 = arith.addf %31, %32 : vector<4x256xf32>
    %cst_14 = arith.constant 5.000000e-01 : f32
    %34 = vector.broadcast %cst_14 : f32 to vector<4x256xf32>
    %35 = arith.mulf %34, %33 : vector<4x256xf32>
    %cst_15 = arith.constant 4.471500e-02 : f32
    %36 = vector.broadcast %cst_15 : f32 to vector<4x256xf32>
    %37 = arith.mulf %36, %33 : vector<4x256xf32>
    %38 = arith.mulf %37, %33 : vector<4x256xf32>
    %39 = arith.mulf %38, %33 : vector<4x256xf32>
    %40 = arith.addf %33, %39 : vector<4x256xf32>
    %cst_16 = arith.constant 0.797884583 : f32
    %41 = vector.broadcast %cst_16 : f32 to vector<4x256xf32>
    %42 = arith.mulf %41, %40 : vector<4x256xf32>
    %43 = math.tanh %42 : vector<4x256xf32>
    %cst_17 = arith.constant 1.000000e+00 : f32
    %44 = vector.broadcast %cst_17 : f32 to vector<4x256xf32>
    %45 = arith.addf %44, %43 : vector<4x256xf32>
    %46 = arith.mulf %35, %45 : vector<4x256xf32>
    %cst_18 = arith.constant 0.000000e+00 : f32
    %47 = vector.shape_cast %4 : vector<1x256xi1> to vector<1x256xi1>
    %48 = vector.broadcast %47 : vector<1x256xi1> to vector<4x256xi1>
    %49 = vector.broadcast %cst_18 : f32 to vector<4x256xf32>
    %50 = arith.select %48, %46, %49 : vector<4x256xi1>, vector<4x256xf32>
    %c0_19 = arith.constant 0 : index
    %c0_20 = arith.constant 0 : index
    %51 = vector.load %arg3[%c0_19, %c0_20] : memref<8x8xf32, #tpu.memory_space<vmem>>, vector<8x8xf32>
    %cst_21 = arith.constant dense<0.000000e+00> : vector<8x256xf32>
    %52 = tpu.matmul %51, %1, %cst_21 {dimension_numbers = #tpu.dot_dimension_numbers<[1], [0], [0], [1], [0, 0, 1, 1], [], []>} : vector<8x8xf32>, vector<8x256xf32>, vector<8x256xf32> -> vector<8x256xf32>
    %c0_22 = arith.constant 0 : index
    %c0_23 = arith.constant 0 : index
    %53 = vector.load %arg4[%c0_22, %c0_23] : memref<8x4xf32, #tpu.memory_space<vmem>>, vector<8x4xf32>
    %cst_24 = arith.constant dense<0.000000e+00> : vector<8x256xf32>
    %54 = tpu.matmul %53, %50, %cst_24 {dimension_numbers = #tpu.dot_dimension_numbers<[1], [0], [0], [1], [0, 0, 1, 1], [], []>} : vector<8x4xf32>, vector<4x256xf32>, vector<8x256xf32> -> vector<8x256xf32>
    %55 = arith.addf %52, %54 : vector<8x256xf32>
    %c0_25 = arith.constant 0 : index
    %c0_26 = arith.constant 0 : index
    %56 = vector.load %arg9[%c0_25, %c0_26] : memref<8x1xf32, #tpu.memory_space<vmem>>, vector<8x1xf32>
    %c0_27 = arith.constant 0 : index
    %c0_28 = arith.constant 0 : index
    %57 = vector.load %arg10[%c0_27, %c0_28] : memref<8x1xf32, #tpu.memory_space<vmem>>, vector<8x1xf32>
    %cst_29 = arith.constant dense<0.000000e+00> : vector<8xf32>
    %58 = vector.multi_reduction <add>, %55, %cst_29 [1] : vector<8x256xf32> to vector<8xf32>
    %59 = vector.shape_cast %58 : vector<8xf32> to vector<8x1xf32>
    %cst_30 = arith.constant 0.0069444445 : f32
    %60 = vector.broadcast %cst_30 : f32 to vector<8x1xf32>
    %61 = arith.mulf %59, %60 : vector<8x1xf32>
    %62 = vector.broadcast %61 : vector<8x1xf32> to vector<8x256xf32>
    %63 = arith.subf %55, %62 : vector<8x256xf32>
    %cst_31 = arith.constant 0.000000e+00 : f32
    %64 = vector.shape_cast %4 : vector<1x256xi1> to vector<1x256xi1>
    %65 = vector.broadcast %64 : vector<1x256xi1> to vector<8x256xi1>
    %66 = vector.broadcast %cst_31 : f32 to vector<8x256xf32>
    %67 = arith.select %65, %63, %66 : vector<8x256xi1>, vector<8x256xf32>
    %68 = arith.mulf %67, %67 : vector<8x256xf32>
    %cst_32 = arith.constant dense<0.000000e+00> : vector<8xf32>
    %69 = vector.multi_reduction <add>, %68, %cst_32 [1] : vector<8x256xf32> to vector<8xf32>
    %70 = vector.shape_cast %69 : vector<8xf32> to vector<8x1xf32>
    %cst_33 = arith.constant 0.0069444445 : f32
    %71 = vector.broadcast %cst_33 : f32 to vector<8x1xf32>
    %72 = arith.mulf %70, %71 : vector<8x1xf32>
    %cst_34 = arith.constant 9.99999974E-6 : f32
    %73 = vector.broadcast %cst_34 : f32 to vector<8x1xf32>
    %74 = arith.addf %72, %73 : vector<8x1xf32>
    %75 = math.rsqrt %74 : vector<8x1xf32>
    %76 = arith.mulf %75, %56 : vector<8x1xf32>
    %77 = arith.mulf %61, %76 : vector<8x1xf32>
    %78 = arith.subf %57, %77 : vector<8x1xf32>
    %79 = vector.broadcast %76 : vector<8x1xf32> to vector<8x256xf32>
    %80 = arith.mulf %55, %79 : vector<8x256xf32>
    %81 = vector.broadcast %78 : vector<8x1xf32> to vector<8x256xf32>
    %82 = arith.addf %80, %81 : vector<8x256xf32>
    %cst_35 = arith.constant 5.000000e-01 : f32
    %83 = vector.broadcast %cst_35 : f32 to vector<8x256xf32>
    %84 = arith.mulf %83, %82 : vector<8x256xf32>
    %cst_36 = arith.constant 4.471500e-02 : f32
    %85 = vector.broadcast %cst_36 : f32 to vector<8x256xf32>
    %86 = arith.mulf %85, %82 : vector<8x256xf32>
    %87 = arith.mulf %86, %82 : vector<8x256xf32>
    %88 = arith.mulf %87, %82 : vector<8x256xf32>
    %89 = arith.addf %82, %88 : vector<8x256xf32>
    %cst_37 = arith.constant 0.797884583 : f32
    %90 = vector.broadcast %cst_37 : f32 to vector<8x256xf32>
    %91 = arith.mulf %90, %89 : vector<8x256xf32>
    %92 = math.tanh %91 : vector<8x256xf32>
    %cst_38 = arith.constant 1.000000e+00 : f32
    %93 = vector.broadcast %cst_38 : f32 to vector<8x256xf32>
    %94 = arith.addf %93, %92 : vector<8x256xf32>
    %95 = arith.mulf %84, %94 : vector<8x256xf32>
    %cst_39 = arith.constant 0.000000e+00 : f32
    %96 = vector.shape_cast %4 : vector<1x256xi1> to vector<1x256xi1>
    %97 = vector.broadcast %96 : vector<1x256xi1> to vector<8x256xi1>
    %98 = vector.broadcast %cst_39 : f32 to vector<8x256xf32>
    %99 = arith.select %97, %95, %98 : vector<8x256xi1>, vector<8x256xf32>
    %c0_40 = arith.constant 0 : index
    %c0_41 = arith.constant 0 : index
    %100 = vector.load %arg5[%c0_40, %c0_41] : memref<8x8xf32, #tpu.memory_space<vmem>>, vector<8x8xf32>
    %cst_42 = arith.constant dense<0.000000e+00> : vector<8x256xf32>
    %101 = tpu.matmul %100, %1, %cst_42 {dimension_numbers = #tpu.dot_dimension_numbers<[1], [0], [0], [1], [0, 0, 1, 1], [], []>} : vector<8x8xf32>, vector<8x256xf32>, vector<8x256xf32> -> vector<8x256xf32>
    %c0_43 = arith.constant 0 : index
    %c0_44 = arith.constant 0 : index
    %102 = vector.load %arg6[%c0_43, %c0_44] : memref<8x8xf32, #tpu.memory_space<vmem>>, vector<8x8xf32>
    %cst_45 = arith.constant dense<0.000000e+00> : vector<8x256xf32>
    %103 = tpu.matmul %102, %99, %cst_45 {dimension_numbers = #tpu.dot_dimension_numbers<[1], [0], [0], [1], [0, 0, 1, 1], [], []>} : vector<8x8xf32>, vector<8x256xf32>, vector<8x256xf32> -> vector<8x256xf32>
    %104 = arith.addf %101, %103 : vector<8x256xf32>
    %c0_46 = arith.constant 0 : index
    %c0_47 = arith.constant 0 : index
    %105 = vector.load %arg11[%c0_46, %c0_47] : memref<8x1xf32, #tpu.memory_space<vmem>>, vector<8x1xf32>
    %c0_48 = arith.constant 0 : index
    %c0_49 = arith.constant 0 : index
    %106 = vector.load %arg12[%c0_48, %c0_49] : memref<8x1xf32, #tpu.memory_space<vmem>>, vector<8x1xf32>
    %cst_50 = arith.constant dense<0.000000e+00> : vector<8xf32>
    %107 = vector.multi_reduction <add>, %104, %cst_50 [1] : vector<8x256xf32> to vector<8xf32>
    %108 = vector.shape_cast %107 : vector<8xf32> to vector<8x1xf32>
    %cst_51 = arith.constant 0.0069444445 : f32
    %109 = vector.broadcast %cst_51 : f32 to vector<8x1xf32>
    %110 = arith.mulf %108, %109 : vector<8x1xf32>
    %111 = vector.broadcast %110 : vector<8x1xf32> to vector<8x256xf32>
    %112 = arith.subf %104, %111 : vector<8x256xf32>
    %cst_52 = arith.constant 0.000000e+00 : f32
    %113 = vector.shape_cast %4 : vector<1x256xi1> to vector<1x256xi1>
    %114 = vector.broadcast %113 : vector<1x256xi1> to vector<8x256xi1>
    %115 = vector.broadcast %cst_52 : f32 to vector<8x256xf32>
    %116 = arith.select %114, %112, %115 : vector<8x256xi1>, vector<8x256xf32>
    %117 = arith.mulf %116, %116 : vector<8x256xf32>
    %cst_53 = arith.constant dense<0.000000e+00> : vector<8xf32>
    %118 = vector.multi_reduction <add>, %117, %cst_53 [1] : vector<8x256xf32> to vector<8xf32>
    %119 = vector.shape_cast %118 : vector<8xf32> to vector<8x1xf32>
    %cst_54 = arith.constant 0.0069444445 : f32
    %120 = vector.broadcast %cst_54 : f32 to vector<8x1xf32>
    %121 = arith.mulf %119, %120 : vector<8x1xf32>
    %cst_55 = arith.constant 9.99999974E-6 : f32
    %122 = vector.broadcast %cst_55 : f32 to vector<8x1xf32>
    %123 = arith.addf %121, %122 : vector<8x1xf32>
    %124 = math.rsqrt %123 : vector<8x1xf32>
    %125 = arith.mulf %124, %105 : vector<8x1xf32>
    %126 = arith.mulf %110, %125 : vector<8x1xf32>
    %127 = arith.subf %106, %126 : vector<8x1xf32>
    %128 = vector.broadcast %125 : vector<8x1xf32> to vector<8x256xf32>
    %129 = arith.mulf %104, %128 : vector<8x256xf32>
    %130 = vector.broadcast %127 : vector<8x1xf32> to vector<8x256xf32>
    %131 = arith.addf %129, %130 : vector<8x256xf32>
    %cst_56 = arith.constant 5.000000e-01 : f32
    %132 = vector.broadcast %cst_56 : f32 to vector<8x256xf32>
    %133 = arith.mulf %132, %131 : vector<8x256xf32>
    %cst_57 = arith.constant 4.471500e-02 : f32
    %134 = vector.broadcast %cst_57 : f32 to vector<8x256xf32>
    %135 = arith.mulf %134, %131 : vector<8x256xf32>
    %136 = arith.mulf %135, %131 : vector<8x256xf32>
    %137 = arith.mulf %136, %131 : vector<8x256xf32>
    %138 = arith.addf %131, %137 : vector<8x256xf32>
    %cst_58 = arith.constant 0.797884583 : f32
    %139 = vector.broadcast %cst_58 : f32 to vector<8x256xf32>
    %140 = arith.mulf %139, %138 : vector<8x256xf32>
    %141 = math.tanh %140 : vector<8x256xf32>
    %cst_59 = arith.constant 1.000000e+00 : f32
    %142 = vector.broadcast %cst_59 : f32 to vector<8x256xf32>
    %143 = arith.addf %142, %141 : vector<8x256xf32>
    %144 = arith.mulf %133, %143 : vector<8x256xf32>
    %145 = vector.extract_strided_slice %144 {offsets = [0, 0], sizes = [4, 256], strides = [1, 1]} : vector<8x256xf32> to vector<4x256xf32>
    %146 = vector.extract_strided_slice %144 {offsets = [4, 0], sizes = [4, 256], strides = [1, 1]} : vector<8x256xf32> to vector<4x256xf32>
    %147 = math.cos %146 : vector<4x256xf32>
    %148 = arith.mulf %145, %147 : vector<4x256xf32>
    %c0_60 = arith.constant 0 : index
    %c0_61 = arith.constant 0 : index
    %c0_62 = arith.constant 0 : index
    %149 = vector.load %arg13[%c0_60, %c0_61, %c0_62] : memref<1x4x256xf32, #tpu.memory_space<vmem>>, vector<1x4x256xf32>
    %150 = vector.shape_cast %149 : vector<1x4x256xf32> to vector<4x256xf32>
    %151 = vector.shape_cast %148 : vector<4x256xf32> to vector<1x4x256xf32>
    tpu.vector_store %arg13[%c0_60, %c0_61, %c0_62], %151 {strides = array<i32>} : memref<1x4x256xf32, #tpu.memory_space<vmem>>, vector<1x4x256xf32>,
    %152 = math.sin %146 : vector<4x256xf32>
    %153 = arith.mulf %145, %152 : vector<4x256xf32>
    %c0_63 = arith.constant 0 : index
    %c0_64 = arith.constant 0 : index
    %c0_65 = arith.constant 0 : index
    %154 = vector.load %arg14[%c0_63, %c0_64, %c0_65] : memref<1x4x256xf32, #tpu.memory_space<vmem>>, vector<1x4x256xf32>
    %155 = vector.shape_cast %154 : vector<1x4x256xf32> to vector<4x256xf32>
    %156 = vector.shape_cast %153 : vector<4x256xf32> to vector<1x4x256xf32>
    tpu.vector_store %arg14[%c0_63, %c0_64, %c0_65], %156 {strides = array<i32>} : memref<1x4x256xf32, #tpu.memory_space<vmem>>, vector<1x4x256xf32>,
    return
  }
  func.func @transform_0(%arg0: i32) -> (i32, i32, i32) {
    %c0_i32 = arith.constant 0 : i32
    %c0_i32_0 = arith.constant 0 : i32
    %c0_i32_1 = arith.constant 0 : i32
    return %arg0, %c0_i32, %c0_i32_0 : i32, i32, i32
  }
  func.func @transform_1(%arg0: i32) -> (i32, i32) {
    %c0_i32 = arith.constant 0 : i32
    %c0_i32_0 = arith.constant 0 : i32
    %c0_i32_1 = arith.constant 0 : i32
    return %c0_i32, %c0_i32_0 : i32, i32
  }
  func.func @transform_2(%arg0: i32) -> (i32, i32) {
    %c0_i32 = arith.constant 0 : i32
    %c0_i32_0 = arith.constant 0 : i32
    %c0_i32_1 = arith.constant 0 : i32
    return %c0_i32, %c0_i32_0 : i32, i32
  }
  func.func @transform_3(%arg0: i32) -> (i32, i32) {
    %c0_i32 = arith.constant 0 : i32
    %c0_i32_0 = arith.constant 0 : i32
    %c0_i32_1 = arith.constant 0 : i32
    return %c0_i32, %c0_i32_0 : i32, i32
  }
  func.func @transform_4(%arg0: i32) -> (i32, i32) {
    %c0_i32 = arith.constant 0 : i32
    %c0_i32_0 = arith.constant 0 : i32
    %c0_i32_1 = arith.constant 0 : i32
    return %c0_i32, %c0_i32_0 : i32, i32
  }
  func.func @transform_5(%arg0: i32) -> (i32, i32) {
    %c0_i32 = arith.constant 0 : i32
    %c0_i32_0 = arith.constant 0 : i32
    %c0_i32_1 = arith.constant 0 : i32
    return %c0_i32, %c0_i32_0 : i32, i32
  }
  func.func @transform_6(%arg0: i32) -> (i32, i32) {
    %c0_i32 = arith.constant 0 : i32
    %c0_i32_0 = arith.constant 0 : i32
    %c0_i32_1 = arith.constant 0 : i32
    return %c0_i32, %c0_i32_0 : i32, i32
  }
  func.func @transform_7(%arg0: i32) -> (i32, i32) {
    %c0_i32 = arith.constant 0 : i32
    %c0_i32_0 = arith.constant 0 : i32
    %c0_i32_1 = arith.constant 0 : i32
    return %c0_i32, %c0_i32_0 : i32, i32
  }
  func.func @transform_8(%arg0: i32) -> (i32, i32) {
    %c0_i32 = arith.constant 0 : i32
    %c0_i32_0 = arith.constant 0 : i32
    %c0_i32_1 = arith.constant 0 : i32
    return %c0_i32, %c0_i32_0 : i32, i32
  }
  func.func @transform_9(%arg0: i32) -> (i32, i32) {
    %c0_i32 = arith.constant 0 : i32
    %c0_i32_0 = arith.constant 0 : i32
    %c0_i32_1 = arith.constant 0 : i32
    return %c0_i32, %c0_i32_0 : i32, i32
  }
  func.func @transform_10(%arg0: i32) -> (i32, i32) {
    %c0_i32 = arith.constant 0 : i32
    %c0_i32_0 = arith.constant 0 : i32
    %c0_i32_1 = arith.constant 0 : i32
    return %c0_i32, %c0_i32_0 : i32, i32
  }
  func.func @transform_11(%arg0: i32) -> (i32, i32) {
    %c0_i32 = arith.constant 0 : i32
    %c0_i32_0 = arith.constant 0 : i32
    %c0_i32_1 = arith.constant 0 : i32
    return %c0_i32, %c0_i32_0 : i32, i32
  }
  func.func @transform_12(%arg0: i32) -> (i32, i32, i32) {
    %c0_i32 = arith.constant 0 : i32
    %c0_i32_0 = arith.constant 0 : i32
    %c0_i32_1 = arith.constant 0 : i32
    return %arg0, %c0_i32, %c0_i32_0 : i32, i32, i32
  }
  func.func @transform_13(%arg0: i32) -> (i32, i32, i32) {
    %c0_i32 = arith.constant 0 : i32
    %c0_i32_0 = arith.constant 0 : i32
    %c0_i32_1 = arith.constant 0 : i32
    return %arg0, %c0_i32, %c0_i32_0 : i32, i32, i32
  }
}

</mosaic_0001>

<bundles_post_ra>
// kernel: reverse.0
= control target key start
LH: loop header
LB: loop body
LE: loop exit
PB: predicated region body
PF: predicated region fallthrough
CT: control target
= control target key end

     0   :  { %v72_v3 = vlaneseq  ;;  %v65_v6 = vld [vmem:[#allocation0 + $0x7] ss:$-1 sm:$0xff]  ;;  %v79_v8 = vld [vmem:[#allocation0 + $0x17] ss:$-1 sm:$0xff]  ;;  %s331_s0 = inlined_call_operand.vmem [shape: f32[2,4,16,7], index: 0, kind: input, shape index: {}]   ;;  %s332_s1 = inlined_call_operand.vmem [shape: f32[2,4,16,7], index: 1, kind: output, shape index: {}]  }
   0x1   :  { %v45_v0 = vld [vmem:[%s331_s0] sm:$0xff]  ;;  %v47_v1 = vld [vmem:[%s331_s0 + $0x8] sm:$0xff]  ;;  %v49_v2 = vld [vmem:[%s331_s0 + $0x10] sm:$0xff]  ;;  %v66_v12 = vrot.slane %v65_v6, 1  ;;  %v80_v13 = vrot.slane %v79_v8, 1 }
   0x2   :  { %46 = vst [vmem:[#allocation0 + $0x8] sm:$0xff] %v45_v0  ;;  %v51_v4 = vld [vmem:[%s331_s0 + $0x18] sm:$0xff]  ;;  %v53_v5 = vld [vmem:[%s331_s0 + $0x20] sm:$0xff]  ;;  %v55_v7 = vld [vmem:[%s331_s0 + $0x28] sm:$0xff]  ;;  %v73_v10 = vshrl.u32 %v72_v3, 7 }
   0x3   :  { %48 = vst [vmem:[#allocation0 + $0x18] sm:$0xff] %v47_v1  ;;  %v57_v9 = vld [vmem:[%s331_s0 + $0x30] sm:$0xff]  ;;  %v59_v11 = vld [vmem:[%s331_s0 + $0x38] sm:$0xff]  ;;  %v93_v14 = vld [vmem:[#allocation0 + $0x27] ss:$-1 sm:$0xff] }
   0x4   :  { %50 = vst [vmem:[#allocation0 + $0x28] sm:$0xff] %v49_v2  ;;  %vm74_vm0 = vcmp.lt.s32.totalorder %v73_v10, 7  ;;  %v107_v16 = vld [vmem:[#allocation0 + $0x37] ss:$-1 sm:$0xff]  ;;  %v94_v19 = vrot.slane %v93_v14, 1 }
   0x5   :  { %52 = vst [vmem:[#allocation0 + $0x38] sm:$0xff] %v51_v4  ;;  %v121_v22 = vld [vmem:[#allocation0 + $0x47] ss:$-1 sm:$0xff]  ;;  %v108_v24 = vrot.slane %v107_v16, 1  ;;  %v135_v28 = vld [vmem:[#allocation0 + $0x57] ss:$-1 sm:$0xff] }
   0x6   :  { %54 = vst [vmem:[#allocation0 + $0x48] sm:$0xff] %v53_v5  ;;  %v122_v29 = vrot.slane %v121_v22, 1  ;;  %v149_v32 = vld [vmem:[#allocation0 + $0x67] ss:$-1 sm:$0xff]  ;;  %v136_v33 = vrot.slane %v135_v28, 1 }
   0x7   :  { %56 = vst [vmem:[#allocation0 + $0x58] sm:$0xff] %v55_v7  ;;  %v163_v36 = vld [vmem:[#allocation0 + $0x77] ss:$-1 sm:$0xff]  ;;  %v150_v37 = vrot.slane %v149_v32, 1 }
   0x8   :  { %58 = vst [vmem:[#allocation0 + $0x68] sm:$0xff] %v57_v9  ;;  %v164_v40 = vrot.slane %v163_v36, 1 }
   0x9   :  { %60 = vst [vmem:[#allocation0 + $0x78] sm:$0xff] %v59_v11  ;;  %v70_v15 = vld [vmem:[#allocation0 + $0xf] ss:$-1 sm:$0xff] }
   0xa   :  { %67 = vst [vmem:[#allocation1] sm:$0xff] %v66_v12  ;;  %v71_v17 = vrot.slane %v70_v15, 1  ;;  %v84_v18 = vld [vmem:[#allocation0 + $0x1f] ss:$-1 sm:$0xff] }
   0xb   :  { %81 = vst [vmem:[#allocation1 + $0x8] sm:$0xff] %v80_v13  ;;  %v85_v20 = vrot.slane %v84_v18, 1  ;;  %v98_v21 = vld [vmem:[#allocation0 + $0x2f] ss:$-1 sm:$0xff] }
   0xc   :  { %75 = vst.msk [vmem:[#allocation1] sm:$0xff] %vm74_vm0, %v71_v17  ;;  %v99_v23 = vrot.slane %v98_v21, 1  ;;  %v112_v25 = vld [vmem:[#allocation0 + $0x3f] ss:$-1 sm:$0xff] }
   0xd   :  { %89 = vst.msk [vmem:[#allocation1 + $0x8] sm:$0xff] %vm74_vm0, %v85_v20  ;;  %v113_v26 = vrot.slane %v112_v25, 1  ;;  %v126_v27 = vld [vmem:[#allocation0 + $0x4f] ss:$-1 sm:$0xff] }
   0xe   :  { %95 = vst [vmem:[#allocation1 + $0x10] sm:$0xff] %v94_v19  ;;  %v140_v30 = vld [vmem:[#allocation0 + $0x5f] ss:$-1 sm:$0xff]  ;;  %v127_v31 = vrot.slane %v126_v27, 1 }
   0xf   :  { %103 = vst.msk [vmem:[#allocation1 + $0x10] sm:$0xff] %vm74_vm0, %v99_v23  ;;  %v154_v34 = vld [vmem:[#allocation0 + $0x6f] ss:$-1 sm:$0xff]  ;;  %v141_v35 = vrot.slane %v140_v30, 1 }
  0x10   :  { %109 = vst [vmem:[#allocation1 + $0x18] sm:$0xff] %v108_v24  ;;  %v168_v38 = vld [vmem:[#allocation0 + $0x7f] ss:$-1 sm:$0xff]  ;;  %v155_v39 = vrot.slane %v154_v34, 1 }
  0x11   :  { %117 = vst.msk [vmem:[#allocation1 + $0x18] sm:$0xff] %vm74_vm0, %v113_v26  ;;  %v169_v41 = vrot.slane %v168_v38, 1 }
  0x12   :  { %123 = vst [vmem:[#allocation1 + $0x20] sm:$0xff] %v122_v29 }
  0x13   :  { %131 = vst.msk [vmem:[#allocation1 + $0x20] sm:$0xff] %vm74_vm0, %v127_v31  ;;  %v216_v42 = vld [vmem:[#allocation1] sm:$0xff] }
  0x14   :  { %137 = vst [vmem:[#allocation1 + $0x28] sm:$0xff] %v136_v33  ;;  %v218_v43 = vld [vmem:[#allocation1 + $0x8] sm:$0xff] }
  0x15   :  { %145 = vst.msk [vmem:[#allocation1 + $0x28] sm:$0xff] %vm74_vm0, %v141_v35 }
  0x16   :  { %151 = vst [vmem:[#allocation1 + $0x30] sm:$0xff] %v150_v37  ;;  %v220_v44 = vld [vmem:[#allocation1 + $0x10] sm:$0xff] }
  0x17   :  { %159 = vst.msk [vmem:[#allocation1 + $0x30] sm:$0xff] %vm74_vm0, %v155_v39 }
  0x18   :  { %165 = vst [vmem:[#allocation1 + $0x38] sm:$0xff] %v164_v40  ;;  %v222_v45 = vld [vmem:[#allocation1 + $0x18] sm:$0xff] }
  0x19   :  { %173 = vst.msk [vmem:[#allocation1 + $0x38] sm:$0xff] %vm74_vm0, %v169_v41 }
  0x1a   :  { %217 = vst [vmem:[%s332_s1] sm:$0xff] %v216_v42  ;;  %v224_v46 = vld [vmem:[#allocation1 + $0x20] sm:$0xff] }
  0x1b   :  { %219 = vst [vmem:[%s332_s1 + $0x8] sm:$0xff] %v218_v43 }
  0x1c   :  { %221 = vst [vmem:[%s332_s1 + $0x10] sm:$0xff] %v220_v44  ;;  %v226_v47 = vld [vmem:[#allocation1 + $0x28] sm:$0xff] }
  0x1d   :  { %223 = vst [vmem:[%s332_s1 + $0x18] sm:$0xff] %v222_v45 }
  0x1e   :  { %225 = vst [vmem:[%s332_s1 + $0x20] sm:$0xff] %v224_v46  ;;  %v228_v48 = vld [vmem:[#allocation1 + $0x30] sm:$0xff] }
  0x1f   :  { %227 = vst [vmem:[%s332_s1 + $0x28] sm:$0xff] %v226_v47 }
  0x20   :  { %229 = vst [vmem:[%s332_s1 + $0x30] sm:$0xff] %v228_v48  ;;  %v230_v49 = vld [vmem:[#allocation1 + $0x38] sm:$0xff] }
  0x21   :  { %231 = vst [vmem:[%s332_s1 + $0x38] sm:$0xff] %v230_v49 }

// kernel: flu_forward.1
= control target key start
LH: loop header
LB: loop body
LE: loop exit
PB: predicated region body
PF: predicated region fallthrough
CT: control target
= control target key end

     0   :  { %s1784_s25 = smov 0   ;;  %s2054_s0 = inlined_call_operand.vmem [shape: f32[2,8,256], index: 0, kind: input, shape index: {}]   ;;  %s2055_s1 = inlined_call_operand.vmem [shape: f32[4,8], index: 1, kind: input, shape index: {}]   ;;  %s2056_s2 = inlined_call_operand.vmem [shape: f32[8,8], index: 2, kind: input, shape index: {}]   ;;  %s2057_s3 = inlined_call_operand.vmem [shape: f32[8,4], index: 3, kind: input, shape index: {}]   ;;  %s2058_s4 = inlined_call_operand.vmem [shape: f32[8,8], index: 4, kind: input, shape index: {}]   ;;  %s2059_s5 = inlined_call_operand.vmem [shape: f32[8,8], index: 5, kind: input, shape index: {}]   ;;  %s2060_s6 = inlined_call_operand.vmem [shape: f32[4,1], index: 6, kind: input, shape index: {}]   ;;  %s2061_s7 = inlined_call_operand.vmem [shape: f32[4,1], index: 7, kind: input, shape index: {}]   ;;  %s2062_s8 = inlined_call_operand.vmem [shape: f32[8,1], index: 8, kind: input, shape index: {}]   ;;  %s2063_s9 = inlined_call_operand.vmem [shape: f32[8,1], index: 9, kind: input, shape index: {}]   ;;  %s2064_s10 = inlined_call_operand.vmem [shape: f32[8,1], index: 10, kind: input, shape index: {}]   ;;  %s2065_s11 = inlined_call_operand.vmem [shape: f32[8,1], index: 11, kind: input, shape index: {}]   ;;  %s2066_s12 = inlined_call_operand.vmem [shape: f32[2,4,256], index: 12, kind: output, shape index: {0}]   ;;  %s2067_s13 = inlined_call_operand.vmem [shape: f32[2,4,256], index: 13, kind: output, shape index: {1}]  }
   0x1 LB: > { %s1622_s26 = sadd.s32 4294967295, %s1705_s25   ;;  %p1626_p0 = scmp.ge.s32.totalorder %s1705_s25, 1  ;;  %s1705_s25 = sphi %s1784_s25, %s24_s25  }
   0x2   : > { %p390_p1 = scmp.lt.s32.totalorder %s1705_s25, 3 }
   0x4   : > { %p391_p2 = pnand %p1626_p0, %p390_p1 }
   0x5   : > { %p439_p3 = scmp.lt.s32.totalorder (!%p391_p2), %s1622_s26, 1 }
   0x6   : > { %394 = sbr.rel (%p391_p2) target bundleno = 1750 (0x6d6), region = 68 }
   0xb   : > { %s2073_s26 = smov (!%p439_p3, %s1622_s26), 1  ;;  %v461_v0 = vld [vmem:[%s2055_s1] sm:$0xf]  ;;  %vm462_vm0 = vcmask 64512   ;;  %vm508_vm1 = vcmask 1043456   ;;  %v456_v8 = vlaneseq  ;;  %v1707_v21 = vmov 0  }
   0xc   : > { %s1660_s27 = sshll.u32 %s2073_s26, 4  ;;  %1678 = vset.pattern.permute.xlu1 %v1707_v21  ;;  %1679 = vset.pattern.permute.xlu0 %v1707_v21  ;;  %v506_v30 = vld [vmem:[%s2060_s6] sm:$0xf]  ;;  %vm581_vm6 = vcmask 31744   ;;  %s1661_s21 = sshll.u32 %s2073_s26, 3 }
   0xd   : > { %s443_s30 = scalar_lea.vmem %s2054_s0, %s1660_s27  ;;  %v457_v9 = vand.u32 127, %v456_v8  ;;  %1680 = vset.pattern.permute.xlu2 %v1707_v21  ;;  %v507_v35 = vld [vmem:[%s2061_s7] sm:$0xf]  ;;  %s448_s24 = scalar_lea.vmem %s2066_s12, %s1661_s21 }
   0xe   : > { %v454_v1 = vld [vmem:[%s443_s30] sm:$0xff]  ;;  %v455_v2 = vld [vmem:[%s443_s30 + $0x8] sm:$0xff]  ;;  %s453_s29 = scalar_lea.vmem %s2067_s13, %s1661_s21 }
   0xf   : > { %481 = vmatpush.msra.mxu0 %v454_v1  ;;  %501 = vmatpush.msra.mxu1 %v455_v2  ;;  %v1805_v10 = vadd.s32 128, %v457_v9  ;;  %v579_v38 = vld [vmem:[%s2056_s2] sm:$0xff] }
  0x10   : > { %1633 = vmatmul.msk.f32.vlgmr.msra.gmra.mxu0 %vm462_vm0, %v461_v0  ;;  %1634 = vmatmul.msk.f32.vlgmr.msra.gmra.mxu1 %vm462_vm0, %v461_v0  ;;  %v580_v61 = vld [vmem:[%s2057_s3] sm:$0xff] }
  0x11   : > { %649 = vmatpush.msrb.mxu0 %v454_v1  ;;  %669 = vmatpush.msrb.mxu1 %v455_v2  ;;  %vm460_vm2 = vcmp.lt.s32.totalorder %v1805_v10, 144  ;;  %v826_v10 = vld [vmem:[%s2064_s10] sm:$0xff] }
  0x13   : > { %801 = vmatpush.msra.mxu0 %v454_v1  ;;  %821 = vmatpush.msra.mxu1 %v455_v2 }
  0x18   : > { %1639 = vmatmul.msk.f32.vlgmr.msrb.gmra.mxu0 %vm462_vm0, %v579_v38  ;;  %1640 = vmatmul.msk.f32.vlgmr.msrb.gmra.mxu1 %vm462_vm0, %v579_v38 }
  0x8d   : > { %v483_v3 = vpop.f32.mrf.mxu0  ;;  %v503_v4 = vpop.f32.mrf.mxu1 }
  0x8e   : > { %v509_v5 = vsel %vm508_vm1, %v483_v3, 0.0  ;;  %v510_v6 = vsel %vm508_vm1, %v503_v4, 0.0 }
  0x8f   : > { %v511_v7 = vadd.f32 %v510_v6, %v509_v5 }
  0x91   : > { %512 = vadd.xlane.f32.xlu0 %v511_v7 }
  0x95   : > { %v651_v0 = vpop.f32.mrf.mxu0  ;;  %v671_v2 = vpop.f32.mrf.mxu1 }
 0x104   : > { %v513_v11 = vpop.xlane.xlu0 %512 }
 0x105   : > { %v514_v12 = vmul.f32 0.0069444445, %v513_v11 }
 0x107   : > { %v516_v13 = vsub.f32 %v503_v4, %v514_v12  ;;  %v515_v14 = vsub.f32 %v483_v3, %v514_v12 }
 0x109   : > { %v522_v15 = vsel %vm460_vm2, %v516_v13, 0.0  ;;  %v523_v16 = vmul.f32 %v515_v14, %v515_v14 }
 0x10a   : > { %v524_v17 = vmul.f32 %v522_v15, %v522_v15 }
 0x10b   : > { %v525_v18 = vsel %vm508_vm1, %v523_v16, 0.0 }
 0x10c   : > { %v526_v19 = vsel %vm508_vm1, %v524_v17, 0.0 }
 0x10d   : > { %v527_v20 = vadd.f32 %v526_v19, %v525_v18 }
 0x10f   : > { %528 = vadd.xlane.f32.xlu0 %v527_v20 }
 0x182   : > { %v529_v22 = vpop.xlane.xlu0 %528 }
 0x183   : > { %v530_v23 = vmul.f32 0.0069444445, %v529_v22 }
 0x185   : > { %v531_v24 = vadd.f32 1e-05, %v530_v23 }
 0x187   : > { %1681 = vrsqrt.f32 %v531_v24  ;;  %vm538_vm4 = vweird.f32 %v531_v24 }
 0x18d   : > { %v1682_v25 = vpop.eup %1681 }
 0x18e   : > { %v533_v26 = vmul.f32 %v1682_v25, %v531_v24  ;;  %vm539_vm3 = vweird.f32 %v1682_v25 }
 0x18f   : > { %vm540_vm5 = vmor %vm538_vm4, %vm539_vm3 }
 0x190   : > { %v534_v27 = vmul.f32 %v1682_v25, %v533_v26 }
 0x192   : > { %v535_v28 = vmul.f32 0.5, %v534_v27 }
 0x194   : > { %v536_v29 = vsub.f32 1.5, %v535_v28 }
 0x196   : > { %v537_v31 = vmul.f32 %v1682_v25, %v536_v29  ;;  %v675_v29 = vld [vmem:[%s2063_s9] sm:$0xff] }
 0x198   : > { %v541_v32 = vsel %vm540_vm5, %v1682_v25, %v537_v31  ;;  %v674_v25 = vld [vmem:[%s2062_s8] sm:$0xff] }
 0x199   : > { %v542_v33 = vmul.f32 %v541_v32, %v506_v30  ;;  %v738_v32 = vld [vmem:[%s2058_s4] sm:$0xff] }
 0x19a   : > { %1644 = vmatmul.msk.f32.vlgmr.msra.gmra.mxu0 %vm462_vm0, %v738_v32  ;;  %1645 = vmatmul.msk.f32.vlgmr.msra.gmra.mxu1 %vm462_vm0, %v738_v32 }
 0x19b   : > { %547 = vperm.xlu1 %1678, %v542_v33   ;;  %v543_v34 = vmul.f32 %v542_v33, %v514_v12 }
 0x19d   : > { %v544_v36 = vsub.f32 %v507_v35, %v543_v34 }
 0x1a3   : > { %554 = vperm.xlu1 %1678, %v544_v36  }
 0x20d   : > { %v548_v37 = vpop.permute.xlu1 %547 }
 0x20e   : > { %v550_v39 = vmul.f32 %v548_v37, %v483_v3  ;;  %v551_v40 = vmul.f32 %v548_v37, %v503_v4 }
 0x215   : > { %v555_v41 = vpop.permute.xlu1 %554 }
 0x216   : > { %v557_v42 = vadd.f32 %v555_v41, %v550_v39  ;;  %v558_v43 = vadd.f32 %v555_v41, %v551_v40 }
 0x218   : > { %v561_v44 = vmul.f32 0.044715, %v557_v42  ;;  %v562_v45 = vmul.f32 0.044715, %v558_v43  ;;  %v559_v56 = vmul.f32 0.5, %v557_v42  ;;  %v560_v58 = vmul.f32 0.5, %v558_v43 }
 0x21a   : > { %v563_v46 = vmul.f32 %v561_v44, %v557_v42  ;;  %v564_v47 = vmul.f32 %v562_v45, %v558_v43 }
 0x21c   : > { %v565_v48 = vmul.f32 %v563_v46, %v557_v42  ;;  %v566_v49 = vmul.f32 %v564_v47, %v558_v43 }
 0x21e   : > { %v567_v50 = vadd.f32 %v565_v48, %v557_v42  ;;  %v568_v51 = vadd.f32 %v566_v49, %v558_v43 }
 0x220   : > { %v569_v52 = vmul.f32 0.7978846, %v567_v50  ;;  %v570_v53 = vmul.f32 0.7978846, %v568_v51 }
 0x222   : > { %1683 = vtanh.f32 %v569_v52 }
 0x223   : > { %1685 = vtanh.f32 %v570_v53 }
 0x228   : > { %v1684_v54 = vpop.eup %1683 }
 0x229   : > { %v1686_v55 = vpop.eup %1685  ;;  %v573_v57 = vadd.f32 1.0, %v1684_v54 }
 0x22a   : > { %v574_v59 = vadd.f32 1.0, %v1686_v55 }
 0x22b   : > { %v575_v60 = vmul.f32 %v573_v57, %v559_v56  ;;  %v739_v56 = vld [vmem:[%s2059_s5] sm:$0xff] }
 0x22c   : > { %v576_v62 = vmul.f32 %v574_v59, %v560_v58  ;;  %v803_v58 = vpop.f32.mrf.mxu0  ;;  %v823_v59 = vpop.f32.mrf.mxu1 }
 0x22d   : > { %1635 = vmatpush.msk.msra.mxu2 %vm508_vm1, %v575_v60 }
 0x22e   : > { %v578_v63 = vsel %vm460_vm2, %v576_v62, 0.0  ;;  %1636 = vmatmul.msk.f32.vlgmr.msra.gmra.mxu2 %vm581_vm6, %v580_v61 }
 0x22f   : > { %1637 = vmatpush.msk.msra.mxu3 %vm508_vm1, %v578_v63 }
 0x230   : > { %1638 = vmatmul.msk.f32.vlgmr.msra.gmra.mxu3 %vm581_vm6, %v580_v61 }
 0x2b1   : > { %v608_v1 = vpop.f32.mrf.mxu2 }
 0x2b2   : > { %v652_v3 = vadd.f32 %v651_v0, %v608_v1 }
 0x2b3   : > { %v628_v4 = vpop.f32.mrf.mxu3 }
 0x2b4   : > { %v672_v5 = vadd.f32 %v671_v2, %v628_v4 }
 0x2b6   : > { %v676_v6 = vadd.f32 %v672_v5, %v652_v3 }
 0x2b8   : > { %677 = vadd.xlane.f32.xlu2 %v676_v6 }
 0x32b   : > { %v678_v7 = vpop.xlane.xlu2 %677 }
 0x32c   : > { %v679_v8 = vmul.f32 0.0069444445, %v678_v7 }
 0x32e   : > { %v681_v9 = vsub.f32 %v672_v5, %v679_v8  ;;  %v680_v11 = vsub.f32 %v652_v3, %v679_v8 }
 0x330   : > { %v683_v12 = vsel %vm460_vm2, %v681_v9, 0.0  ;;  %v684_v13 = vmul.f32 %v680_v11, %v680_v11 }
 0x331   : > { %v685_v14 = vmul.f32 %v683_v12, %v683_v12 }
 0x333   : > { %v686_v15 = vadd.f32 %v685_v14, %v684_v13 }
 0x335   : > { %687 = vadd.xlane.f32.xlu2 %v686_v15 }
 0x3a8   : > { %v688_v16 = vpop.xlane.xlu2 %687 }
 0x3a9   : > { %v689_v17 = vmul.f32 0.0069444445, %v688_v16 }
 0x3ab   : > { %v690_v18 = vadd.f32 1e-05, %v689_v17 }
 0x3ad   : > { %1687 = vrsqrt.f32 %v690_v18  ;;  %vm697_vm8 = vweird.f32 %v690_v18 }
 0x3b3   : > { %v1688_v19 = vpop.eup %1687 }
 0x3b4   : > { %v692_v20 = vmul.f32 %v1688_v19, %v690_v18  ;;  %vm698_vm7 = vweird.f32 %v1688_v19 }
 0x3b5   : > { %vm699_vm9 = vmor %vm697_vm8, %vm698_vm7 }
 0x3b6   : > { %v693_v22 = vmul.f32 %v1688_v19, %v692_v20 }
 0x3b8   : > { %v694_v23 = vmul.f32 0.5, %v693_v22 }
 0x3ba   : > { %v695_v24 = vsub.f32 1.5, %v694_v23  ;;  %v827_v23 = vld [vmem:[%s2065_s11] sm:$0xff] }
 0x3bc   : > { %v696_v26 = vmul.f32 %v1688_v19, %v695_v24 }
 0x3be   : > { %v700_v27 = vsel %vm699_vm9, %v1688_v19, %v696_v26 }
 0x3bf   : > { %v701_v28 = vmul.f32 %v700_v27, %v674_v25 }
 0x3c1   : > { %706 = vperm.xlu0 %1679, %v701_v28   ;;  %v702_v30 = vmul.f32 %v701_v28, %v679_v8 }
 0x3c3   : > { %v703_v31 = vsub.f32 %v675_v29, %v702_v30 }
 0x3c5   : > { %713 = vperm.xlu1 %1678, %v703_v31  }
 0x433   : > { %v707_v33 = vpop.permute.xlu0 %706 }
 0x434   : > { %v709_v34 = vmul.f32 %v707_v33, %v652_v3  ;;  %v710_v35 = vmul.f32 %v707_v33, %v672_v5 }
 0x437   : > { %v714_v36 = vpop.permute.xlu1 %713 }
 0x438   : > { %v716_v37 = vadd.f32 %v714_v36, %v709_v34  ;;  %v717_v38 = vadd.f32 %v714_v36, %v710_v35 }
 0x43a   : > { %v721_v39 = vmul.f32 0.044715, %v717_v38  ;;  %v720_v40 = vmul.f32 0.044715, %v716_v37  ;;  %v718_v51 = vmul.f32 0.5, %v716_v37  ;;  %v719_v53 = vmul.f32 0.5, %v717_v38 }
 0x43c   : > { %v722_v41 = vmul.f32 %v720_v40, %v716_v37  ;;  %v723_v42 = vmul.f32 %v721_v39, %v717_v38 }
 0x43e   : > { %v724_v43 = vmul.f32 %v722_v41, %v716_v37  ;;  %v725_v44 = vmul.f32 %v723_v42, %v717_v38 }
 0x440   : > { %v726_v45 = vadd.f32 %v724_v43, %v716_v37  ;;  %v727_v46 = vadd.f32 %v725_v44, %v717_v38 }
 0x442   : > { %v728_v47 = vmul.f32 0.7978846, %v726_v45  ;;  %v729_v48 = vmul.f32 0.7978846, %v727_v46 }
 0x444   : > { %1689 = vtanh.f32 %v728_v47 }
 0x445   : > { %1691 = vtanh.f32 %v729_v48 }
 0x44a   : > { %v1690_v49 = vpop.eup %1689 }
 0x44b   : > { %v1692_v50 = vpop.eup %1691  ;;  %v732_v52 = vadd.f32 1.0, %v1690_v49 }
 0x44c   : > { %v733_v54 = vadd.f32 1.0, %v1692_v50 }
 0x44d   : > { %v734_v55 = vmul.f32 %v732_v52, %v718_v51 }
 0x44e   : > { %v735_v57 = vmul.f32 %v733_v54, %v719_v53 }
 0x44f   : > { %758 = vmatpush.msrb.mxu2 %v734_v55 }
 0x450   : > { %1642 = vmatpush.msk.msrb.mxu3 %vm460_vm2, %v735_v57  ;;  %1641 = vmatmul.msk.f32.vlgmr.msrb.gmra.mxu2 %vm462_vm0, %v739_v56 }
 0x451   : > { %1643 = vmatmul.msk.f32.vlgmr.msrb.gmra.mxu3 %vm462_vm0, %v739_v56 }
 0x4d3   : > { %v760_v60 = vpop.f32.mrf.mxu2 }
 0x4d4   : > { %v780_v61 = vpop.f32.mrf.mxu3  ;;  %v804_v62 = vadd.f32 %v803_v58, %v760_v60 }
 0x4d5   : > { %v824_v63 = vadd.f32 %v823_v59, %v780_v61 }
 0x4d7   : > { %v828_v0 = vadd.f32 %v824_v63, %v804_v62 }
 0x4d9   : > { %829 = vadd.xlane.f32.xlu2 %v828_v0 }
 0x54c   : > { %v830_v1 = vpop.xlane.xlu2 %829 }
 0x54d   : > { %v831_v2 = vmul.f32 0.0069444445, %v830_v1 }
 0x54f   : > { %v833_v3 = vsub.f32 %v824_v63, %v831_v2  ;;  %v832_v4 = vsub.f32 %v804_v62, %v831_v2 }
 0x551   : > { %v835_v5 = vsel %vm460_vm2, %v833_v3, 0.0  ;;  %v836_v6 = vmul.f32 %v832_v4, %v832_v4 }
 0x552   : > { %v837_v7 = vmul.f32 %v835_v5, %v835_v5 }
 0x554   : > { %v838_v8 = vadd.f32 %v837_v7, %v836_v6 }
 0x556   : > { %839 = vadd.xlane.f32.xlu1 %v838_v8  ;;  %v1708_v8 = vmov 683565275  }
 0x5c9   : > { %v840_v9 = vpop.xlane.xlu1 %839 }
 0x5ca   : > { %v841_v11 = vmul.f32 0.0069444445, %v840_v9 }
 0x5cc   : > { %v842_v12 = vadd.f32 1e-05, %v841_v11  ;;  %v1709_v11 = vmov 2475754826  }
 0x5ce   : > { %1693 = vrsqrt.f32 %v842_v12  ;;  %vm849_vm11 = vweird.f32 %v842_v12 }
 0x5d4   : > { %v1694_v13 = vpop.eup %1693 }
 0x5d5   : > { %v844_v14 = vmul.f32 %v1694_v13, %v842_v12  ;;  %vm850_vm10 = vweird.f32 %v1694_v13 }
 0x5d6   : > { %vm851_vm12 = vmor %vm849_vm11, %vm850_vm10 }
 0x5d7   : > { %v845_v15 = vmul.f32 %v1694_v13, %v844_v14 }
 0x5d9   : > { %v846_v16 = vmul.f32 0.5, %v845_v15  ;;  %v1710_v15 = vmov 2131351028  }
 0x5db   : > { %v847_v17 = vsub.f32 1.5, %v846_v16 }
 0x5dd   : > { %v848_v18 = vmul.f32 %v1694_v13, %v847_v17 }
 0x5df   : > { %v852_v19 = vsel %vm851_vm12, %v1694_v13, %v848_v18 }
 0x5e0   : > { %v853_v20 = vmul.f32 %v852_v19, %v826_v10  ;;  %v1711_v10 = vmov 2102212464  }
 0x5e2   : > { %858 = vperm.xlu2 %1680, %v853_v20   ;;  %v854_v22 = vmul.f32 %v853_v20, %v831_v2  ;;  %v1712_v20 = vmov 920167782  }
 0x5e4   : > { %v855_v24 = vsub.f32 %v827_v23, %v854_v22 }
 0x5ea   : > { %865 = vperm.xlu2 %1680, %v855_v24   ;;  %v1713_v24 = vmov 1326507024  }
 0x63c   : > { %v859_v25 = vpop.permute.xlu2 %858 }
 0x63d   : > { %v861_v26 = vmul.f32 %v859_v25, %v804_v62  ;;  %v862_v27 = vmul.f32 %v859_v25, %v824_v63 }
 0x644   : > { %v866_v28 = vpop.permute.xlu2 %865 }
 0x645   : > { %v868_v29 = vadd.f32 %v866_v28, %v861_v26  ;;  %v869_v30 = vadd.f32 %v866_v28, %v862_v27 }
 0x647   : > { %v872_v31 = vmul.f32 0.044715, %v868_v29  ;;  %v873_v32 = vmul.f32 0.044715, %v869_v30  ;;  %v870_v43 = vmul.f32 0.5, %v868_v29  ;;  %v871_v45 = vmul.f32 0.5, %v869_v30 }
 0x649   : > { %v874_v33 = vmul.f32 %v872_v31, %v868_v29  ;;  %v875_v34 = vmul.f32 %v873_v32, %v869_v30 }
 0x64b   : > { %v876_v35 = vmul.f32 %v874_v33, %v868_v29  ;;  %v877_v36 = vmul.f32 %v875_v34, %v869_v30 }
 0x64d   : > { %v878_v37 = vadd.f32 %v876_v35, %v868_v29  ;;  %v879_v38 = vadd.f32 %v877_v36, %v869_v30 }
 0x64f   : > { %v880_v39 = vmul.f32 0.7978846, %v878_v37  ;;  %v881_v40 = vmul.f32 0.7978846, %v879_v38 }
 0x651   : > { %1695 = vtanh.f32 %v880_v39 }
 0x652   : > { %1697 = vtanh.f32 %v881_v40 }
 0x657   : > { %v1696_v41 = vpop.eup %1695 }
 0x658   : > { %v1698_v42 = vpop.eup %1697  ;;  %v884_v44 = vadd.f32 1.0, %v1696_v41 }
 0x659   : > { %v885_v46 = vadd.f32 1.0, %v1698_v42 }
 0x65a   : > { %v1861_v47 = vmul.f32 %v884_v44, %v870_v43 }
 0x65b   : > { %v1863_v48 = vmul.f32 %v885_v46, %v871_v45 }
 0x65c   : > { %v888_v49 = vand.u32 2147483647, %v1861_v47  ;;  %v891_v50 = vand.u32 2139095040, %v1861_v47 }
 0x65d   : > { %v1042_v51 = vand.u32 2147483647, %v1863_v48  ;;  %v1045_v52 = vand.u32 2139095040, %v1863_v48 }
 0x65e   : > { %v892_v53 = vshrl.u32 %v891_v50, 23  ;;  %v895_v54 = vand.u32 8388607, %v888_v49 }
 0x65f   : > { %v1046_v55 = vshrl.u32 %v1045_v52, 23  ;;  %v1049_v58 = vand.u32 8388607, %v1042_v51 }
 0x660   : > { %v1646_v56 = vadd.s32 4294967169, %v892_v53  ;;  %v896_v57 = vor.u32 8388608, %v895_v54 }
 0x661   : > { %v1649_v59 = vadd.s32 4294967169, %v1046_v55  ;;  %v1050_v63 = vor.u32 8388608, %v1049_v58 }
 0x662   : > { %v898_v60 = vadd.s32 1, %v1646_v56  ;;  %v1873_v62 = vshll.u32 %v896_v57, 8 }
 0x663   : > { %v1052_v61 = vadd.s32 1, %v1649_v59  ;;  %v1880_v6 = vshll.u32 %v1050_v63, 8 }
 0x664   : > { %vm899_vm13 = vcmp.gt.s32.totalorder %v898_v60, 0  ;;  %v1876_v4 = vand.u32 65535, %v1873_v62  ;;  %v938_v13 = vshrl.u32 %v1873_v62, 16 }
 0x665   : > { %v900_v0 = vsel %vm899_vm13, %v898_v60, 0  ;;  %vm1053_vm14 = vcmp.gt.s32.totalorder %v1052_v61, 0 }
 0x666   : > { %v902_v1 = vand.u32 31, %v900_v0  ;;  %v1054_v2 = vsel %vm1053_vm14, %v1052_v61, 0  ;;  %v1882_v7 = vshrl.u32 %v900_v0, 5 }
 0x667   : > { %v1878_v5 = vand.u32 31, %v1054_v2  ;;  %v1920_v56 = vshrl.u32 %v1054_v2, 5 }
 0x668   : > { %v903_v3 = vsub.s32 32, %v902_v1  ;;  %v905_v9 = vshll.u32 %v1708_v8, %v902_v1  ;;  %v908_v12 = vshll.u32 %v1709_v11, %v902_v1  ;;  %v911_v17 = vshll.u32 %v1710_v15, %v902_v1 }
 0x669   : > { %v914_v19 = vshll.u32 %v1711_v10, %v902_v1  ;;  %v917_v23 = vshll.u32 %v1712_v20, %v902_v1  ;;  %v1892_v29 = vsub.s32 32, %v1878_v5  ;;  %vm920_vm15 = vcmp.lt.s32.totalorder %v1882_v7, 1 }
 0x66a   : > { %v906_v14 = vshrl.u32 %v1709_v11, %v903_v3  ;;  %v909_v16 = vshrl.u32 %v1710_v15, %v903_v3  ;;  %v912_v18 = vshrl.u32 %v1711_v10, %v903_v3  ;;  %v915_v22 = vshrl.u32 %v1712_v20, %v903_v3 }
 0x66b   : > { %v918_v25 = vshrl.u32 %v1713_v24, %v903_v3  ;;  %vm921_vm0 = vcmp.lt.s32.totalorder %v1882_v7, 2  ;;  %v904_v32 = vshrl.u32 %v1708_v8, %v903_v3  ;;  %vm923_vm2 = vcmp.lt.s32.totalorder %v1882_v7, 4 }
 0x66c   : > { %v907_v26 = vor.u32 %v906_v14, %v905_v9  ;;  %v910_v27 = vor.u32 %v909_v16, %v908_v12  ;;  %v913_v28 = vor.u32 %v912_v18, %v911_v17  ;;  %v916_v30 = vor.u32 %v915_v22, %v914_v19 }
 0x66d   : > { %v919_v31 = vor.u32 %v918_v25, %v917_v23  ;;  %vm922_vm3 = vcmp.lt.s32.totalorder %v1882_v7, 3  ;;  %v1059_v37 = vshll.u32 %v1708_v8, %v1878_v5  ;;  %v1060_v41 = vshrl.u32 %v1709_v11, %v1892_v29 }
 0x66e   : > { %v928_v33 = vsel %vm920_vm15, %v907_v26, %v910_v27  ;;  %v932_v34 = vsel %vm920_vm15, %v910_v27, %v913_v28  ;;  %v929_v35 = vsel %vm923_vm2, %v916_v30, 920167782  ;;  %v925_v38 = vsel %vm923_vm2, %v913_v28, 2102212464 }
 0x66f   : > { %v933_v36 = vsel %vm923_vm2, %v919_v31, 1326507024  ;;  %v930_v39 = vsel %vm922_vm3, %v913_v28, %v929_v35  ;;  %v1062_v44 = vshll.u32 %v1709_v11, %v1878_v5  ;;  %v1063_v45 = vshrl.u32 %v1710_v15, %v1892_v29 }
 0x670   : > { %v934_v40 = vsel %vm922_vm3, %v916_v30, %v933_v36  ;;  %v931_v42 = vsel %vm921_vm0, %v928_v33, %v930_v39  ;;  %v924_v54 = vsel %vm920_vm15, %v904_v32, %v907_v26  ;;  %v926_v55 = vsel %vm922_vm3, %v910_v27, %v925_v38 }
 0x671   : > { %v935_v43 = vsel %vm921_vm0, %v932_v34, %v934_v40  ;;  %v961_v52 = vand.u32 65535, %v931_v42  ;;  %v962_v53 = vshrl.u32 %v931_v42, 16  ;;  %v1922_v57 = vor.u32 %v1060_v41, %v1059_v37 }
 0x672   : > { %v939_v46 = vand.u32 65535, %v935_v43  ;;  %v940_v50 = vshrl.u32 %v935_v43, 16  ;;  %v1925_v60 = vor.u32 %v1063_v45, %v1062_v44  ;;  %v1066_v61 = vshrl.u32 %v1711_v10, %v1892_v29 }
 0x673   : > { %v964_v0 = vmul.u32 %v962_v53, %v1876_v4  ;;  %v965_v1 = vmul.u32 %v961_v52, %v938_v13  ;;  %v1065_v3 = vshll.u32 %v1710_v15, %v1878_v5  ;;  %v963_v11 = vmul.u32 %v961_v52, %v1876_v4 }
 0x674   : > { %v942_v58 = vmul.u32 %v940_v50, %v1876_v4  ;;  %v943_v59 = vmul.u32 %v939_v46, %v938_v13  ;;  %v941_v63 = vmul.u32 %v939_v46, %v1876_v4  ;;  %v944_v9 = vmul.u32 %v940_v50, %v938_v13 }
 0x675   : > { %v966_v12 = vmul.u32 %v962_v53, %v938_v13  ;;  %v967_v18 = vshll.u32 %v964_v0, 16  ;;  %v969_v22 = vshll.u32 %v965_v1, 16  ;;  %v1933_v23 = vor.u32 %v1066_v61, %v1065_v3 }
 0x676   : > { %v945_v2 = vshll.u32 %v942_v58, 16  ;;  %v946_v14 = vshrl.u32 %v942_v58, 16  ;;  %v947_v16 = vshll.u32 %v943_v59, 16  ;;  %v948_v17 = vshrl.u32 %v943_v59, 16 }
 0x677   : > { %vm971_vm5 = vc.u32 %v963_v11, %v967_v18  ;;  %v973_v26 = vadd.s32 %v967_v18, %v963_v11  ;;  %v1069_v15 = vshrl.u32 %v1712_v20, %v1892_v29  ;;  %v1068_v13 = vshll.u32 %v1711_v10, %v1878_v5 }
 0x678   : > { %vm949_vm4 = vc.u32 %v941_v63, %v945_v2  ;;  %v951_v19 = vadd.s32 %v945_v2, %v941_v63  ;;  %v972_v4 = vsel %vm971_vm5, 1, %v1707_v21  ;;  %v1071_v31 = vshll.u32 %v1712_v20, %v1878_v5 }
 0x679   : > { %v950_v25 = vsel %vm949_vm4, 1, %v1707_v21  ;;  %v974_v30 = vadd.s32 %v972_v4, %v966_v12  ;;  %vm975_vm7 = vc.u32 %v973_v26, %v969_v22  ;;  %v1070_v34 = vor.u32 %v1069_v15, %v1068_v13 }
 0x67a   : > { %v952_v27 = vadd.s32 %v950_v25, %v944_v9  ;;  %vm953_vm6 = vc.u32 %v951_v19, %v947_v16  ;;  %v976_v33 = vsel %vm975_vm7, 1, %v1707_v21  ;;  %v1072_v35 = vshrl.u32 %v1713_v24, %v1892_v29 }
 0x67b   : > { %v954_v28 = vsel %vm953_vm6, 1, %v1707_v21  ;;  %v968_v36 = vshrl.u32 %v964_v0, 16  ;;  %v970_v37 = vshrl.u32 %v965_v1, 16  ;;  %v1947_v38 = vadd.s32 %v973_v26, %v969_v22 }
 0x67c   : > { %v956_v32 = vadd.s32 %v954_v28, %v952_v27  ;;  %v978_v39 = vadd.s32 %v976_v33, %v974_v30  ;;  %v1073_v40 = vor.u32 %v1072_v35, %v1071_v31  ;;  %vm1074_vm8 = vcmp.lt.s32.totalorder %v1920_v56, 1 }
 0x67d   : > { %vm1077_vm9 = vcmp.lt.s32.totalorder %v1920_v56, 4  ;;  %vm1076_vm10 = vcmp.lt.s32.totalorder %v1920_v56, 3  ;;  %v1082_v5 = vsel %vm1074_vm8, %v1922_v57, %v1925_v60  ;;  %vm1075_vm11 = vcmp.lt.s32.totalorder %v1920_v56, 2 }
 0x67e   : > { %v957_v10 = vadd.s32 %v956_v32, %v946_v14  ;;  %v979_v41 = vadd.s32 %v978_v39, %v968_v36  ;;  %v1083_v20 = vsel %vm1077_vm9, %v1070_v34, 920167782  ;;  %v1086_v43 = vsel %vm1074_vm8, %v1925_v60, %v1933_v23 }
 0x67f   : > { %v1084_v42 = vsel %vm1076_vm10, %v1933_v23, %v1083_v20  ;;  %v927_v44 = vsel %vm921_vm0, %v924_v54, %v926_v55  ;;  %v1087_v50 = vsel %vm1077_vm9, %v1073_v40, 1326507024  ;;  %v1091_v53 = vand.u32 65535, %v1880_v6 }
 0x680   : > { %v1958_v24 = vadd.s32 %v957_v10, %v948_v17  ;;  %v980_v45 = vadd.s32 %v979_v41, %v970_v37  ;;  %v1085_v46 = vsel %vm1075_vm11, %v1082_v5, %v1084_v42  ;;  %v1088_v52 = vsel %vm1076_vm10, %v1070_v34, %v1087_v50 }
 0x681   : > { %v1115_v58 = vand.u32 65535, %v1085_v46  ;;  %v1089_v7 = vsel %vm1075_vm11, %v1086_v43, %v1088_v52  ;;  %v1092_v54 = vshrl.u32 %v1880_v6, 16  ;;  %v1116_v55 = vshrl.u32 %v1085_v46, 16 }
 0x682   : > { %vm983_vm12 = vc.u32 %v1958_v24, %v1947_v38  ;;  %v984_v59 = vadd.s32 1, %v980_v45  ;;  %v981_v61 = vmul.u32 %v1873_v62, %v927_v44  ;;  %v1093_v63 = vand.u32 65535, %v1089_v7 }
 0x683   : > { %v1094_v0 = vshrl.u32 %v1089_v7, 16  ;;  %v1118_v3 = vmul.u32 %v1116_v55, %v1091_v53  ;;  %v1119_v9 = vmul.u32 %v1115_v58, %v1092_v54  ;;  %v1117_v14 = vmul.u32 %v1115_v58, %v1091_v53 }
 0x684   : > { %v985_v1 = vsel %vm983_vm12, %v984_v59, %v980_v45  ;;  %v1097_v12 = vmul.u32 %v1093_v63, %v1092_v54  ;;  %v1120_v16 = vmul.u32 %v1116_v55, %v1092_v54  ;;  %v1095_v19 = vmul.u32 %v1093_v63, %v1091_v53 }
 0x685   : > { %v986_v2 = vadd.s32 %v985_v1, %v981_v61  ;;  %v1096_v11 = vmul.u32 %v1094_v0, %v1091_v53  ;;  %v1121_v17 = vshll.u32 %v1118_v3, 16  ;;  %v1098_v22 = vmul.u32 %v1094_v0, %v1092_v54 }
 0x686   : > { %v1101_v26 = vshll.u32 %v1097_v12, 16  ;;  %v1123_v15 = vshll.u32 %v1119_v9, 16  ;;  %v1079_v32 = vsel %vm1077_vm9, %v1933_v23, 2102212464  ;;  %v1058_v34 = vshrl.u32 %v1708_v8, %v1892_v29 }
 0x687   : > { %v987_v18 = vadd.s32 536870912, %v986_v2  ;;  %v1099_v25 = vshll.u32 %v1096_v11, 16  ;;  %vm1125_vm13 = vc.u32 %v1117_v14, %v1121_v17  ;;  %v1127_v27 = vadd.s32 %v1121_v17, %v1117_v14 }
 0x688   : > { %v1126_v13 = vsel %vm1125_vm13, 1, %v1707_v21  ;;  %v1100_v39 = vshrl.u32 %v1096_v11, 16  ;;  %v1078_v41 = vsel %vm1074_vm8, %v1058_v34, %v1922_v57  ;;  %v1080_v23 = vsel %vm1076_vm10, %v1925_v60, %v1079_v32 }
 0x689   : > { %v1983_v62 = vshrl.u32 %v987_v18, 30  ;;  %vm1103_vm14 = vc.u32 %v1095_v19, %v1099_v25  ;;  %v1105_v4 = vadd.s32 %v1099_v25, %v1095_v19  ;;  %v1128_v30 = vadd.s32 %v1126_v13, %v1120_v16 }
 0x68a   : > { %v1104_v28 = vsel %vm1103_vm14, 1, %v1707_v21  ;;  %vm1129_vm15 = vc.u32 %v1127_v27, %v1123_v15  ;;  %v1122_v5 = vshrl.u32 %v1118_v3, 16  ;;  %v1102_v29 = vshrl.u32 %v1097_v12, 16 }
 0x68b   : > { %v989_v31 = vshll.u32 %v1983_v62, 30  ;;  %v1106_v33 = vadd.s32 %v1104_v28, %v1098_v22  ;;  %vm1107_vm0 = vc.u32 %v1105_v4, %v1101_v26  ;;  %v1130_v36 = vsel %vm1129_vm15, 1, %v1707_v21 }
 0x68c   : > { %v1108_v35 = vsel %vm1107_vm0, 1, %v1707_v21  ;;  %v1132_v40 = vadd.s32 %v1130_v36, %v1128_v30  ;;  %v1124_v42 = vshrl.u32 %v1119_v9, 16  ;;  %v1081_v44 = vsel %vm1075_vm11, %v1078_v41, %v1080_v23 }
 0x68d   : > { %v990_v37 = vsub.s32 %v986_v2, %v989_v31  ;;  %v1110_v10 = vadd.s32 %v1108_v35, %v1106_v33  ;;  %v1131_v50 = vadd.s32 %v1127_v27, %v1123_v15  ;;  %v1135_v60 = vmul.u32 %v1880_v6, %v1081_v44 }
 0x68e   : > { %v1133_v43 = vadd.s32 %v1132_v40, %v1122_v5  ;;  %v982_v54 = vadd.s32 %v1947_v38, %v1958_v24  ;;  %vm890_vm6 = vcmp.lt.s32.totalorder %v1861_v47, 0  ;;  %vm2009_vm7 = vcmp.le.f32.partialorder %v888_v49, 0.7853982 }
 0x68f   : > { %vm991_vm2 = vcmp.lt.s32.totalorder %v990_v37, 0  ;;  %v992_v20 = vsub.s32 0, %v990_v37  ;;  %v1111_v8 = vadd.s32 %v1110_v10, %v1100_v39  ;;  %v1012_v23 = vsub.s32 4, %v1983_v62 }
 0x690   : > { %v1134_v52 = vadd.s32 %v1133_v43, %v1124_v42  ;;  %vm1044_vm9 = vcmp.lt.s32.totalorder %v1863_v48, 0  ;;  %vm2025_vm10 = vcmp.le.f32.partialorder %v1042_v51, 0.7853982 }
 0x691   : > { %v993_v21 = vsel %vm991_vm2, %v992_v20, %v990_v37  ;;  %v1112_v46 = vadd.s32 %v1111_v8, %v1102_v29  ;;  %v1013_v43 = vsel %vm890_vm6, %v1012_v23, %v1983_v62  ;;  %vm1031_vm2 = vweird.f32 %v1861_v47 }
 0x692   : > { %v994_v45 = vclz %v993_v21  ;;  %v1138_v53 = vadd.s32 1, %v1134_v52 }
 0x693   : > { %vm1137_vm3 = vc.u32 %v1112_v46, %v1131_v50  ;;  %v1136_v28 = vadd.s32 %v1131_v50, %v1112_v46 }
 0x694   : > { %v1647_v57 = vadd.s32 4294967294, %v994_v45  ;;  %v1139_v58 = vsel %vm1137_vm3, %v1138_v53, %v1134_v52  ;;  %v1015_v52 = vsel %vm2009_vm7, 0, %v1013_v43 }
 0x695   : > { %v1140_v7 = vadd.s32 %v1139_v58, %v1135_v60 }
 0x696   : > { %vm1648_vm4 = vcmp.lt.s32.totalorder %v1647_v57, 0 }
 0x697   : > { %v997_v59 = vsel %vm1648_vm4, 0, %v1647_v57  ;;  %v1141_v56 = vadd.s32 536870912, %v1140_v7 }
 0x698   : > { %v998_v55 = vsub.s32 32, %v997_v59  ;;  %v1002_v61 = vsub.s32 4294967266, %v997_v59  ;;  %v999_v63 = vshll.u32 %v990_v37, %v997_v59 }
 0x699   : > { %v1142_v3 = vshrl.u32 %v1141_v56, 30 }
 0x69a   : > { %v1000_v0 = vshrl.u32 %v982_v54, %v998_v55  ;;  %v1003_v1 = vadd.s32 127, %v1002_v61  ;;  %v1354_v54 = vadd.s32 3, %v1015_v52 }
 0x69b   : > { %v1143_v11 = vshll.u32 %v1142_v3, 30  ;;  %v1166_v50 = vsub.s32 4, %v1142_v3 }
 0x69c   : > { %v1001_v9 = vor.u32 %v1000_v0, %v999_v63  ;;  %v1004_v2 = vshll.u32 %v1003_v1, 23  ;;  %v1032_v0 = vand.u32 3, %v1015_v52 }
 0x69d   : > { %v1144_v14 = vsub.s32 %v1140_v7, %v1143_v11  ;;  %v1167_v58 = vsel %vm1044_vm9, %v1166_v50, %v1142_v3 }
 0x69e   : > { %v1005_v12 = vor.u32 4788187, %v1004_v2  ;;  %v1008_v16 = vcvt.s32.f32 %v1001_v9  ;;  %v1169_v63 = vsel %vm2025_vm10, 0, %v1167_v58  ;;  %v1355_v2 = vand.u32 3, %v1354_v54 }
 0x69f   : > { %vm1145_vm5 = vcmp.lt.s32.totalorder %v1144_v14, 0  ;;  %v1146_v17 = vsub.s32 0, %v1144_v14  ;;  %vm1034_vm11 = vcmp.eq.s32.totalorder %v1032_v0, 0  ;;  %vm1037_vm13 = vcmp.eq.s32.totalorder %v1032_v0, 2 }
 0x6a0   : > { %v1006_v6 = vand.u32 2147483647, %v1005_v12  ;;  %vm1357_vm12 = vcmp.eq.s32.totalorder %v1355_v2, 0  ;;  %vm1360_vm14 = vcmp.eq.s32.totalorder %v1355_v2, 2  ;;  %vm1033_vm15 = vcmp.lt.s32.totalorder %v1032_v0, 2 }
 0x6a1   : > { %v1147_v19 = vsel %vm1145_vm5, %v1146_v17, %v1144_v14  ;;  %vm1356_vm0 = vcmp.lt.s32.totalorder %v1355_v2, 2 }
 0x6a2   : > { %v1009_v18 = vmul.f32 %v1008_v16, %v1006_v6  ;;  %v1148_v38 = vclz %v1147_v19  ;;  %v1509_v6 = vadd.s32 3, %v1169_v63  ;;  %v1186_v19 = vand.u32 3, %v1169_v63 }
 0x6a4   : > { %v1010_v22 = vxor.u32 2147483648, %v1009_v18  ;;  %v1650_v26 = vadd.s32 4294967294, %v1148_v38  ;;  %vm1187_vm3 = vcmp.lt.s32.totalorder %v1186_v19, 2  ;;  %vm1188_vm4 = vcmp.eq.s32.totalorder %v1186_v19, 0 }
 0x6a5   : > { %vm1191_vm5 = vcmp.eq.s32.totalorder %v1186_v19, 2 }
 0x6a6   : > { %v1011_v25 = vsel %vm890_vm6, %v1010_v22, %v1009_v18  ;;  %vm1651_vm8 = vcmp.lt.s32.totalorder %v1650_v26, 0 }
 0x6a7   : > { %v1014_v15 = vsel %vm2009_vm7, %v1861_v47, %v1011_v25  ;;  %v1151_v4 = vsel %vm1651_vm8, 0, %v1650_v26  ;;  %v1510_v25 = vand.u32 3, %v1509_v6 }
 0x6a8   : > { %v1016_v27 = vmul.f32 %v1014_v15, %v1014_v15  ;;  %v1152_v30 = vsub.s32 32, %v1151_v4  ;;  %v1156_v31 = vsub.s32 4294967266, %v1151_v4  ;;  %v1153_v34 = vshll.u32 %v1144_v14, %v1151_v4 }
 0x6a9   : > { %vm1511_vm6 = vcmp.lt.s32.totalorder %v1510_v25, 2  ;;  %vm1512_vm7 = vcmp.eq.s32.totalorder %v1510_v25, 0  ;;  %vm1515_vm8 = vcmp.eq.s32.totalorder %v1510_v25, 2 }
 0x6aa   : > { %v1024_v13 = vmul.f32 -0.00019511016, %v1016_v27  ;;  %v1017_v32 = vmul.f32 -0.001358992, %v1016_v27  ;;  %v1154_v33 = vshrl.u32 %v1136_v28, %v1152_v30  ;;  %v1157_v35 = vadd.s32 127, %v1156_v31 }
 0x6ac   : > { %v1025_v49 = vadd.f32 0.008332121, %v1024_v13  ;;  %v1155_v37 = vor.u32 %v1154_v33, %v1153_v34  ;;  %v1158_v39 = vshll.u32 %v1157_v35, 23  ;;  %v1018_v10 = vadd.f32 0.041655596, %v1017_v32 }
 0x6ae   : > { %v1026_v36 = vmul.f32 %v1025_v49, %v1016_v27  ;;  %v1159_v40 = vor.u32 4788187, %v1158_v39  ;;  %v1162_v20 = vcvt.s32.f32 %v1155_v37  ;;  %v1019_v8 = vmul.f32 %v1018_v10, %v1016_v27 }
 0x6b0   : > { %v1027_v41 = vadd.f32 -0.16666654, %v1026_v36  ;;  %v1160_v5 = vand.u32 2147483647, %v1159_v40  ;;  %v1020_v44 = vadd.f32 -0.4999988, %v1019_v8 }
 0x6b2   : > { %v1163_v29 = vmul.f32 %v1162_v20, %v1160_v5  ;;  %v1028_v42 = vmul.f32 %v1027_v41, %v1016_v27  ;;  %v1021_v60 = vmul.f32 %v1020_v44, %v1016_v27 }
 0x6b4   : > { %v1164_v21 = vxor.u32 2147483648, %v1163_v29  ;;  %v1029_v57 = vadd.f32 1.0, %v1028_v42  ;;  %v1022_v56 = vadd.f32 1.0, %v1021_v60 }
 0x6b6   : > { %v1165_v46 = vsel %vm1044_vm9, %v1164_v21, %v1163_v29  ;;  %v1030_v51 = vmul.f32 %v1029_v57, %v1014_v15  ;;  %v1038_v16 = vxor.u32 2147483648, %v1022_v56  ;;  %vm1185_vm9 = vweird.f32 %v1863_v48 }
 0x6b7   : > { %v1168_v62 = vsel %vm2025_vm10, %v1863_v48, %v1165_v46 }
 0x6b8   : > { %v1170_v53 = vmul.f32 %v1168_v62, %v1168_v62  ;;  %v1035_v11 = vxor.u32 2147483648, %v1030_v51  ;;  %v1039_v26 = vsel %vm1037_vm13, %v1038_v16, %v1030_v51  ;;  %v1362_v15 = vsel %vm1360_vm14, %v1038_v16, %v1030_v51 }
 0x6ba   : > { %v1171_v59 = vmul.f32 -0.001358992, %v1170_v53  ;;  %v1178_v7 = vmul.f32 -0.00019511016, %v1170_v53  ;;  %v1036_v18 = vsel %vm1034_vm11, %v1022_v56, %v1035_v11  ;;  %v1359_v22 = vsel %vm1357_vm12, %v1022_v56, %v1035_v11 }
 0x6bb   : > { %v1040_v27 = vsel %vm1033_vm15, %v1036_v18, %v1039_v26  ;;  %v1363_v28 = vsel %vm1356_vm0, %v1359_v22, %v1362_v15 }
 0x6bc   : > { %v1172_v55 = vadd.f32 0.041655596, %v1171_v59  ;;  %v1179_v61 = vadd.f32 0.008332121, %v1178_v7  ;;  %v1041_v31 = vsel %vm1031_vm2, nan, %v1040_v27  ;;  %v1364_v32 = vsel %vm1031_vm2, nan, %v1363_v28 }
 0x6bd   : > { %v1198_v40 = vrot.slane %v1041_v31, 4  ;;  %v1522_v23 = vrot.slane %v1364_v32, 4 }
 0x6be   : > { %v1173_v1 = vmul.f32 %v1172_v55, %v1170_v53  ;;  %v1180_v9 = vmul.f32 %v1179_v61, %v1170_v53 }
 0x6bf   : > { %v1202_v29 = vmul.f32 %v1198_v40, %v1861_v47  ;;  %v1526_v43 = vmul.f32 %v1522_v23, %v1861_v47 }
 0x6c0   : > { %v1174_v12 = vadd.f32 -0.4999988, %v1173_v1  ;;  %v1181_v14 = vadd.f32 -0.16666654, %v1180_v9 }
 0x6c2   : > { %v1175_v3 = vmul.f32 %v1174_v12, %v1170_v53  ;;  %v1182_v17 = vmul.f32 %v1181_v14, %v1170_v53 }
 0x6c4   : > { %v1176_v38 = vadd.f32 1.0, %v1175_v3  ;;  %v1183_v24 = vadd.f32 1.0, %v1182_v17 }
 0x6c6   : > { %v1184_v4 = vmul.f32 %v1183_v24, %v1168_v62  ;;  %v1192_v13 = vxor.u32 2147483648, %v1176_v38 }
 0x6c8   : > { %v1189_v30 = vxor.u32 2147483648, %v1184_v4  ;;  %v1193_v33 = vsel %vm1191_vm5, %v1192_v13, %v1184_v4  ;;  %v1517_v35 = vsel %vm1515_vm8, %v1192_v13, %v1184_v4 }
 0x6ca   : > { %v1190_v49 = vsel %vm1188_vm4, %v1176_v38, %v1189_v30  ;;  %v1514_v34 = vsel %vm1512_vm7, %v1176_v38, %v1189_v30 }
 0x6cb   : > { %v1194_v36 = vsel %vm1187_vm3, %v1190_v49, %v1193_v33  ;;  %v1518_v37 = vsel %vm1511_vm6, %v1514_v34, %v1517_v35 }
 0x6cc   : > { %v1195_v39 = vsel %vm1185_vm9, nan, %v1194_v36  ;;  %v1519_v10 = vsel %vm1185_vm9, nan, %v1518_v37 }
 0x6cd   : > { %v1199_v41 = vrot.slane %v1195_v39, 4  ;;  %v1523_v5 = vrot.slane %v1519_v10, 4 }
 0x6cf   : > { %v1203_v20 = vmul.f32 %v1199_v41, %v1863_v48  ;;  %v1527_v8 = vmul.f32 %v1523_v5, %v1863_v48 }
 0x6d1   : > { %v1206_v42 = vrot.slane %v1203_v20, 4  ;;  %v1530_v21 = vrot.slane %v1527_v8, 4 }
 0x6d3   : > { %v1207_v44 = vsel %vm508_vm1, %v1202_v29, %v1206_v42  ;;  %v1531_v45 = vsel %vm508_vm1, %v1526_v43, %v1530_v21 }
 0x6d4   : > { %1209 = vst [vmem:[%s448_s24] sm:$0xff] %v1207_v44 }
 0x6d5   : > { %1533 = vst [vmem:[%s453_s29] sm:$0xff] %v1531_v45 }
 0x6d6 PF: > { %s24_s25 = sadd.s32 1, %s1705_s25  }
 0x6d7   : > { %p21_p4 = scmp.ge.s32.totalorder %s24_s25, 4  }
 0x6d9   :  { %23 = sbr.rel (!%p21_p4) target bundleno = 1 (0x1), region = 110 }

</bundles_post_ra>
